<compile_context>
chip_gen: v7x
topology: tpu7x:2x2x1
jax: 0.10.0
libtpu: 0.0.40
codegen_flags: <defaults>
</compile_context>

<pallas_src>
import functools

import jax
import jax.numpy as jnp
from jax.experimental import pallas as pl
from jax.experimental.pallas import tpu as pltpu


def _chip_defaults():
    """Row-tile target and scoped-VMEM limit per TPU generation."""
    kind = ""
    try:
        kind = jax.devices()[0].device_kind.lower()
    except Exception:
        pass
    old_gen = any(t in kind for t in ("v4", "v5", "v6"))   # 128 MiB physical VMEM
    tile = 512 if old_gen else 256                          # conservative on v7x (64 MiB)
    vmem = (64 if old_gen else 32) * 1024 * 1024
    return tile, vmem


_ROW_TILE_TARGET, _VMEM_LIMIT = _chip_defaults()


def _row_tile(rows):
    # Fixed tile + cdiv grid (partial last block handled by Pallas) instead of a
    # divisibility search that collapses at awkward row counts.
    return rows if rows <= _ROW_TILE_TARGET else _ROW_TILE_TARGET


def _compiler_params():
    return pltpu.CompilerParams(
        dimension_semantics=("parallel",),
        vmem_limit_bytes=_VMEM_LIMIT)


# -------------------- patch embed + cls prepend + pos_embed add (fused) -------------------- #

def _embed_kernel(xp_ref, w_ref, b_ref, cls_ref, pos_ref, o_ref):
    # One image per grid step.
    tok = jnp.dot(xp_ref[0].astype(jnp.bfloat16), w_ref[...],
                  preferred_element_type=jnp.float32) + b_ref[...]
    pos = pos_ref[...]                                     # (N, D) f32
    o_ref[0, 0:1, :] = (cls_ref[...] + pos[0:1, :]).astype(o_ref.dtype)
    o_ref[0, 1:, :] = (tok + pos[1:, :]).astype(o_ref.dtype)


def pallas_patch_embed(xp, w, b, cls_tok, pos):
    bsz, npatch, cpp = xp.shape
    d = w.shape[1]
    n = npatch + 1
    flops = 2 * bsz * npatch * cpp * d
    bytes_accessed = xp.size * 4 + cpp * d * 2 + n * d * 4 + bsz * n * d * 2
    return pl.pallas_call(
        _embed_kernel,
        out_shape=jax.ShapeDtypeStruct((bsz, n, d), jnp.bfloat16),
        grid=(bsz,),
        in_specs=[
            pl.BlockSpec((1, npatch, cpp), lambda i: (i, 0, 0)),
            pl.BlockSpec((cpp, d), lambda i: (0, 0)),
            pl.BlockSpec((1, d), lambda i: (0, 0)),
            pl.BlockSpec((1, d), lambda i: (0, 0)),
            pl.BlockSpec((n, d), lambda i: (0, 0)),
        ],
        out_specs=pl.BlockSpec((1, n, d), lambda i: (i, 0, 0)),
        cost_estimate=pl.CostEstimate(flops=flops, transcendentals=0,
                                      bytes_accessed=bytes_accessed),
        compiler_params=_compiler_params(),
    )(xp, w.astype(jnp.bfloat16), b.reshape(1, d).astype(jnp.float32),
      cls_tok.reshape(1, d).astype(jnp.float32),
      pos.reshape(n, d).astype(jnp.float32))


# ------------------------------- fused LayerNorm + matmul (qkv) ---------------------------- #

def _ln_matmul_kernel(x_ref, g_ref, bt_ref, w_ref, bias_ref, o_ref, *, eps):
    x = x_ref[...].astype(jnp.float32)                     # LN math in f32
    mu = jnp.mean(x, axis=-1, keepdims=True)
    xc = x - mu
    var = jnp.mean(xc * xc, axis=-1, keepdims=True)
    h = xc * jax.lax.rsqrt(var + eps) * g_ref[...] + bt_ref[...]
    y = jnp.dot(h.astype(jnp.bfloat16), w_ref[...],
                preferred_element_type=jnp.float32) + bias_ref[...]
    o_ref[...] = y.astype(o_ref.dtype)


def pallas_ln_matmul(x2d, gamma, beta, w, b):
    rows, din = x2d.shape
    dout = w.shape[1]
    tile = _row_tile(rows)
    flops = 2 * rows * din * dout
    bytes_accessed = rows * din * 2 + din * dout * 2 + rows * dout * 2
    return pl.pallas_call(
        functools.partial(_ln_matmul_kernel, eps=1e-6),
        out_shape=jax.ShapeDtypeStruct((rows, dout), jnp.bfloat16),
        grid=(pl.cdiv(rows, tile),),
        in_specs=[
            pl.BlockSpec((tile, din), lambda i: (i, 0)),
            pl.BlockSpec((1, din), lambda i: (0, 0)),
            pl.BlockSpec((1, din), lambda i: (0, 0)),
            # TODO(synk): on v7x add pipeline_mode=pl.Buffered(1) to the grid-invariant
            # weight/bias specs below to avoid dead double-buffer VMEM.
            pl.BlockSpec((din, dout), lambda i: (0, 0)),
            pl.BlockSpec((1, dout), lambda i: (0, 0)),
        ],
        out_specs=pl.BlockSpec((tile, dout), lambda i: (i, 0)),
        cost_estimate=pl.CostEstimate(flops=flops, transcendentals=rows,
                                      bytes_accessed=bytes_accessed),
        compiler_params=_compiler_params(),
    )(x2d, gamma.reshape(1, din).astype(jnp.float32),
      beta.reshape(1, din).astype(jnp.float32),
      w.astype(jnp.bfloat16), b.reshape(1, dout).astype(jnp.float32))


# ----------------- multi-head self-attention + output projection + residual ---------------- #

def _attn_kernel(qkv_ref, w_ref, b_ref, res_ref, o_ref, acc_ref,
                 *, num_heads, dh, scale):
    qkv = qkv_ref[0]                                       # (N, 3D) bf16, lane-dense load
    d = num_heads * dh
    # Output-projection accumulator starts at residual + proj bias (f32, VMEM scratch).
    acc_ref[...] = res_ref[0].astype(jnp.float32) + b_ref[...]
    for h in range(num_heads):                             # static unroll; streamed per head
        q = (qkv[:, h * dh:(h + 1) * dh].astype(jnp.float32) * scale).astype(jnp.bfloat16)
        k = qkv[:, d + h * dh:d + (h + 1) * dh]
        v = qkv[:, 2 * d + h * dh:2 * d + (h + 1) * dh]
        s = jax.lax.dot_general(q, k, (((1,), (1,)), ((), ())),
                                preferred_element_type=jnp.float32)        # (N, N) f32
        s = s - jnp.max(s, axis=-1, keepdims=True)
        p = jnp.exp(s)
        inv = pl.reciprocal(jnp.sum(p, axis=-1, keepdims=True), approx=True)
        oh = jnp.dot(p.astype(jnp.bfloat16), v,
                     preferred_element_type=jnp.float32) * inv             # (N, dh)
        acc_ref[...] += jnp.dot(oh.astype(jnp.bfloat16),
                                w_ref[h * dh:(h + 1) * dh, :],
                                preferred_element_type=jnp.float32)
    o_ref[0] = acc_ref[...].astype(o_ref.dtype)            # one lane-dense store


def pallas_attention(qkv3d, proj_w, proj_b, res3d, num_heads, scale):
    bsz, n, threed = qkv3d.shape
    d = threed // 3
    dh = d // num_heads
    flops = bsz * (num_heads * 4 * n * n * dh + 2 * n * d * d)
    transc = bsz * num_heads * n * n
    bytes_accessed = (qkv3d.size + 2 * res3d.size) * 2 + d * d * 2
    return pl.pallas_call(
        functools.partial(_attn_kernel, num_heads=num_heads, dh=dh, scale=scale),
        out_shape=jax.ShapeDtypeStruct((bsz, n, d), jnp.bfloat16),
        grid=(bsz,),
        in_specs=[
            pl.BlockSpec((1, n, threed), lambda b: (b, 0, 0)),
            pl.BlockSpec((d, d), lambda b: (0, 0)),
            pl.BlockSpec((1, d), lambda b: (0, 0)),
            pl.BlockSpec((1, n, d), lambda b: (b, 0, 0)),
        ],
        out_specs=pl.BlockSpec((1, n, d), lambda b: (b, 0, 0)),
        scratch_shapes=[pltpu.VMEM((n, d), jnp.float32)],
        cost_estimate=pl.CostEstimate(flops=flops, transcendentals=transc,
                                      bytes_accessed=bytes_accessed),
        compiler_params=_compiler_params(),
    )(qkv3d, proj_w.astype(jnp.bfloat16),
      proj_b.reshape(1, d).astype(jnp.float32), res3d)


# -------------------- fused MLP branch: LN2 + fc1 + GELU + fc2 + residual ------------------- #

def _mlp_kernel(x_ref, g_ref, bt_ref, w1_ref, b1_ref, w2_ref, b2_ref, o_ref, *, eps):
    x = x_ref[...].astype(jnp.float32)
    mu = jnp.mean(x, axis=-1, keepdims=True)
    xc = x - mu
    var = jnp.mean(xc * xc, axis=-1, keepdims=True)
    h = xc * jax.lax.rsqrt(var + eps) * g_ref[...] + bt_ref[...]
    h1 = jnp.dot(h.astype(jnp.bfloat16), w1_ref[...],
                 preferred_element_type=jnp.float32) + b1_ref[...]
    # TODO(synk): timm's nn.GELU is exact erf-GELU; tanh approximation used for TPU lowering.
    h1 = jax.nn.gelu(h1, approximate=True)
    y = jnp.dot(h1.astype(jnp.bfloat16), w2_ref[...],
                preferred_element_type=jnp.float32) + b2_ref[...] + x
    o_ref[...] = y.astype(o_ref.dtype)


def pallas_mlp(x2d, gamma, beta, w1, b1, w2, b2):
    rows, d = x2d.shape
    hid = w1.shape[1]
    tile = _row_tile(rows)
    flops = 4 * rows * d * hid
    transc = rows * hid + rows
    bytes_accessed = rows * d * 2 * 2 + d * hid * 2 * 2
    return pl.pallas_call(
        functools.partial(_mlp_kernel, eps=1e-6),
        out_shape=jax.ShapeDtypeStruct((rows, d), jnp.bfloat16),
        grid=(pl.cdiv(rows, tile),),
        in_specs=[
            pl.BlockSpec((tile, d), lambda i: (i, 0)),
            pl.BlockSpec((1, d), lambda i: (0, 0)),
            pl.BlockSpec((1, d), lambda i: (0, 0)),
            pl.BlockSpec((d, hid), lambda i: (0, 0)),
            pl.BlockSpec((1, hid), lambda i: (0, 0)),
            pl.BlockSpec((hid, d), lambda i: (0, 0)),
            pl.BlockSpec((1, d), lambda i: (0, 0)),
        ],
        out_specs=pl.BlockSpec((tile, d), lambda i: (i, 0)),
        cost_estimate=pl.CostEstimate(flops=flops, transcendentals=transc,
                                      bytes_accessed=bytes_accessed),
        compiler_params=_compiler_params(),
    )(x2d, gamma.reshape(1, d).astype(jnp.float32),
      beta.reshape(1, d).astype(jnp.float32),
      w1.astype(jnp.bfloat16), b1.reshape(1, hid).astype(jnp.float32),
      w2.astype(jnp.bfloat16), b2.reshape(1, d).astype(jnp.float32))


# --------------------- fused final LayerNorm + age head + gender head ---------------------- #

def _heads_kernel(x_ref, ng_ref, nb_ref, aw1_ref, ab1_ref, aw2_ref, ab2_ref,
                  gw_ref, gb_ref, o_ref, *, eps):
    x = x_ref[...].astype(jnp.float32)
    mu = jnp.mean(x, axis=-1, keepdims=True)
    xc = x - mu
    var = jnp.mean(xc * xc, axis=-1, keepdims=True)
    feat = xc * jax.lax.rsqrt(var + eps) * ng_ref[...] + nb_ref[...]
    fb = feat.astype(jnp.bfloat16)
    h = jnp.dot(fb, aw1_ref[...], preferred_element_type=jnp.float32) + ab1_ref[...]
    h = jnp.maximum(h, 0.0)
    age = jnp.dot(h.astype(jnp.bfloat16), aw2_ref[...],
                  preferred_element_type=jnp.float32) + ab2_ref[...]
    gender = jax.nn.sigmoid(
        jnp.dot(fb, gw_ref[...], preferred_element_type=jnp.float32) + gb_ref[...])
    o_ref[...] = jnp.concatenate([age, gender], axis=-1).astype(o_ref.dtype)


def pallas_heads(x2d, p, eps=1e-6):
    rows, d = x2d.shape
    hdim = p["age_w1"].shape[1]                # 128 (96 padded to lane-dense width)
    tile = _row_tile(rows)
    return pl.pallas_call(
        functools.partial(_heads_kernel, eps=eps),
        out_shape=jax.ShapeDtypeStruct((rows, 2), jnp.float32),
        grid=(pl.cdiv(rows, tile),),
        in_specs=[
            pl.BlockSpec((tile, d), lambda i: (i, 0)),
            pl.BlockSpec((1, d), lambda i: (0, 0)),
            pl.BlockSpec((1, d), lambda i: (0, 0)),
            pl.BlockSpec((d, hdim), lambda i: (0, 0)),
            pl.BlockSpec((1, hdim), lambda i: (0, 0)),
            pl.BlockSpec((hdim, 1), lambda i: (0, 0)),
            pl.BlockSpec((1, 1), lambda i: (0, 0)),
            pl.BlockSpec((d, 1), lambda i: (0, 0)),
            pl.BlockSpec((1, 1), lambda i: (0, 0)),
        ],
        out_specs=pl.BlockSpec((tile, 2), lambda i: (i, 0)),
        compiler_params=_compiler_params(),
    )(x2d,
      p["norm_g"].reshape(1, d), p["norm_b"].reshape(1, d),
      p["age_w1"], p["age_b1"].reshape(1, hdim),
      p["age_w2"], p["age_b2"].reshape(1, 1),
      p["gen_w"], p["gen_b"].reshape(1, 1))


# --------------------------------- parameter construction --------------------------------- #

def init_params(key, *, in_chans, patch, embed_dim, depth, num_heads, mlp_hidden, num_tokens):
    del num_heads  # static config, not part of the traced pytree
    keys = iter(jax.random.split(key, 6 + 4 * depth))

    def wmat(shape, scale=0.02):               # MXU matmul weights stored as bf16
        return (scale * jax.random.normal(next(keys), shape)).astype(jnp.bfloat16)

    def wf32(shape, scale=0.02):
        return (scale * jax.random.normal(next(keys), shape)).astype(jnp.float32)

    def z(shape):
        return jnp.zeros(shape, jnp.float32)

    # Age head: conceptually 96 hidden units; padded to 128 lanes with zero cols/rows
    # (mathematically identical output, lane-dense MXU tiles, no masked stores).
    age_w1 = jnp.pad(0.02 * jax.random.normal(next(keys), (embed_dim, 96)),
                     ((0, 0), (0, 32))).astype(jnp.bfloat16)
    age_w2 = jnp.pad(0.02 * jax.random.normal(next(keys), (96, 1)),
                     ((0, 32), (0, 0))).astype(jnp.bfloat16)

    params = {
        # patch embed: Conv2d(in_chans, D, kernel=patch, stride=patch) as a matmul
        "patch_w": wmat((in_chans * patch * patch, embed_dim)),
        "patch_b": z((embed_dim,)),
        "cls_token": wf32((1, 1, embed_dim)),
        "pos_embed": wf32((1, num_tokens, embed_dim)),
        "norm_g": jnp.ones((embed_dim,), jnp.float32),
        "norm_b": z((embed_dim,)),
        "age_w1": age_w1, "age_b1": z((128,)),
        "age_w2": age_w2, "age_b2": z((1,)),
        "gen_w": wmat((embed_dim, 1)), "gen_b": z((1,)),
        "blocks": [],
    }
    for _ in range(depth):
        params["blocks"].append({
            "ln1_g": jnp.ones((embed_dim,), jnp.float32), "ln1_b": z((embed_dim,)),
            "qkv_w": wmat((embed_dim, 3 * embed_dim)),    "qkv_b": z((3 * embed_dim,)),
            "proj_w": wmat((embed_dim, embed_dim)),       "proj_b": z((embed_dim,)),
            "ln2_g": jnp.ones((embed_dim,), jnp.float32), "ln2_b": z((embed_dim,)),
            "fc1_w": wmat((embed_dim, mlp_hidden)),       "fc1_b": z((mlp_hidden,)),
            "fc2_w": wmat((mlp_hidden, embed_dim)),       "fc2_b": z((embed_dim,)),
        })
    return params


# --------------------------------------- forward ------------------------------------------ #

def vit_for_age_forward(params, x, *, patch, num_heads):
    # x: [B, C, H, W] float32 (NCHW, like PyTorch).  `patch` / `num_heads` are static ints.
    B, C, H, W = x.shape
    D = params["patch_w"].shape[1]
    nH, nW = H // patch, W // patch
    npatch = nH * nW

    # im2col unfold (pure layout glue) -> fused patch-matmul + cls + pos_embed + bf16 cast.
    xp = (x.reshape(B, C, nH, patch, nW, patch)
           .transpose(0, 2, 4, 1, 3, 5)
           .reshape(B, npatch, C * patch * patch))
    x3d = pallas_patch_embed(xp, params["patch_w"], params["patch_b"],
                             params["cls_token"], params["pos_embed"])   # [B, N, D] bf16
    N = x3d.shape[1]
    # TODO(synk): residual stream is carried in bf16 (PyTorch keeps it f32); switch the
    # residual/output dtype to f32 if bit-level parity over deep stacks matters.
    x2d = x3d.reshape(B * N, D)

    dh = D // num_heads
    scale = dh ** -0.5

    for blk in params["blocks"]:
        # attention branch: fused LN1+qkv -> fused attention+proj+residual
        qkv = pallas_ln_matmul(x2d, blk["ln1_g"], blk["ln1_b"],
                               blk["qkv_w"], blk["qkv_b"])               # [B*N, 3D]
        x2d = pallas_attention(qkv.reshape(B, N, 3 * D), blk["proj_w"], blk["proj_b"],
                               x2d.reshape(B, N, D), num_heads, scale).reshape(B * N, D)
        # MLP branch: single fused LN2+fc1+GELU+fc2+residual kernel (hidden never leaves VMEM)
        x2d = pallas_mlp(x2d, blk["ln2_g"], blk["ln2_b"], blk["fc1_w"], blk["fc1_b"],
                         blk["fc2_w"], blk["fc2_b"])

    # final LayerNorm (forward_features) + both heads fused; col 0 = age, col 1 = gender
    heads_out = pallas_heads(x2d, params)                                # [B*N, 2] f32
    age = heads_out[:, 0:1].reshape(B, N, 1)
    gender = heads_out[:, 1:2].reshape(B, N, 1)
    return age, gender


# ----------------------------------------- main -------------------------------------------- #

if __name__ == "__main__":
    # Small ViT-consistent shapes: 32x32 image, patch 16 -> 4 patches + cls = 5 tokens.
    B, C, IMG, PATCH = 2, 3, 32, 16
    EMBED, DEPTH, HEADS, MLP = 32, 2, 4, 128
    N_TOKENS = (IMG // PATCH) ** 2 + 1

    key = jax.random.PRNGKey(0)
    k_params, k_x = jax.random.split(key)
    params = init_params(k_params, in_chans=C, patch=PATCH, embed_dim=EMBED,
                         depth=DEPTH, num_heads=HEADS, mlp_hidden=MLP,
                         num_tokens=N_TOKENS)
    x = jax.random.normal(k_x, (B, C, IMG, IMG), jnp.float32)

    fwd = jax.jit(vit_for_age_forward, static_argnames=("patch", "num_heads"))
    age, gender = fwd(params, x, patch=PATCH, num_heads=HEADS)
    jax.block_until_ready((age, gender))

    assert age.shape == (B, N_TOKENS, 1) and gender.shape == (B, N_TOKENS, 1)
    assert bool(jnp.all(jnp.isfinite(age)))
    assert bool(jnp.all((gender >= 0.0) & (gender <= 1.0)))
    print("KERNEL_OK")
</pallas_src>

<mosaic_0001>
module attributes {stable_mosaic.version = 11 : i64} {
  func.func @_embed_kernel(%arg0: i32, %arg1: memref<1x4x768xf32, #tpu.memory_space<vmem>>, %arg2: memref<768x32xbf16, #tpu.memory_space<vmem>>, %arg3: memref<1x32xf32, #tpu.memory_space<vmem>>, %arg4: memref<1x32xf32, #tpu.memory_space<vmem>>, %arg5: memref<5x32xf32, #tpu.memory_space<vmem>>, %arg6: memref<1x5x32xbf16, #tpu.memory_space<vmem>>) attributes {dimension_semantics = [#tpu.dimension_semantics<parallel>], iteration_bounds = array<i64: 2>, scalar_prefetch = 0 : i64, scratch_operands = 0 : i64, tpu.core_type = #tpu.core_type<tc>, window_params = [{transform_indices = @transform_0, window_bounds = array<i64: 1, 4, 768>}, {pipeline_mode = #tpu.pipeline_mode<synchronous>, transform_indices = @transform_1, window_bounds = array<i64: 768, 32>}, {pipeline_mode = #tpu.pipeline_mode<synchronous>, transform_indices = @transform_2, window_bounds = array<i64: 1, 32>}, {pipeline_mode = #tpu.pipeline_mode<synchronous>, transform_indices = @transform_3, window_bounds = array<i64: 1, 32>}, {pipeline_mode = #tpu.pipeline_mode<synchronous>, transform_indices = @transform_4, window_bounds = array<i64: 5, 32>}, {transform_indices = @transform_5, window_bounds = array<i64: 1, 5, 32>}]} {
    %c0 = arith.constant 0 : index
    %c0_0 = arith.constant 0 : index
    %c0_1 = arith.constant 0 : index
    %0 = vector.load %arg1[%c0, %c0_0, %c0_1] : memref<1x4x768xf32, #tpu.memory_space<vmem>>, vector<1x4x768xf32>
    %1 = vector.shape_cast %0 : vector<1x4x768xf32> to vector<4x768xf32>
    %2 = arith.truncf %1 : vector<4x768xf32> to vector<4x768xbf16>
    %c0_2 = arith.constant 0 : index
    %c0_3 = arith.constant 0 : index
    %3 = vector.load %arg2[%c0_2, %c0_3] : memref<768x32xbf16, #tpu.memory_space<vmem>>, vector<768x32xbf16>
    %cst = arith.constant dense<0.000000e+00> : vector<4x32xf32>
    %4 = tpu.matmul %2, %3, %cst {dimension_numbers = #tpu.dot_dimension_numbers<[1], [0], [0], [1], [0, 0, 1, 1], [], []>} : vector<4x768xbf16>, vector<768x32xbf16>, vector<4x32xf32> -> vector<4x32xf32>
    %c0_4 = arith.constant 0 : index
    %c0_5 = arith.constant 0 : index
    %5 = vector.load %arg3[%c0_4, %c0_5] : memref<1x32xf32, #tpu.memory_space<vmem>>, vector<1x32xf32>
    %6 = vector.broadcast %5 : vector<1x32xf32> to vector<4x32xf32>
    %7 = arith.addf %4, %6 : vector<4x32xf32>
    %c0_6 = arith.constant 0 : index
    %c0_7 = arith.constant 0 : index
    %8 = vector.load %arg5[%c0_6, %c0_7] : memref<5x32xf32, #tpu.memory_space<vmem>>, vector<5x32xf32>
    %c0_8 = arith.constant 0 : index
    %c0_9 = arith.constant 0 : index
    %9 = vector.load %arg4[%c0_8, %c0_9] : memref<1x32xf32, #tpu.memory_space<vmem>>, vector<1x32xf32>
    %10 = vector.extract_strided_slice %8 {offsets = [0, 0], sizes = [1, 32], strides = [1, 1]} : vector<5x32xf32> to vector<1x32xf32>
    %11 = arith.addf %9, %10 : vector<1x32xf32>
    %12 = arith.truncf %11 : vector<1x32xf32> to vector<1x32xbf16>
    %c0_10 = arith.constant 0 : index
    %c0_11 = arith.constant 0 : index
    %c0_12 = arith.constant 0 : index
    %13 = vector.load %arg6[%c0_10, %c0_11, %c0_12] : memref<1x5x32xbf16, #tpu.memory_space<vmem>>, vector<1x1x32xbf16>
    %14 = vector.shape_cast %13 : vector<1x1x32xbf16> to vector<1x32xbf16>
    %15 = vector.shape_cast %12 : vector<1x32xbf16> to vector<1x1x32xbf16>
    tpu.vector_store %arg6[%c0_10, %c0_11, %c0_12], %15 {strides = array<i32>} : memref<1x5x32xbf16, #tpu.memory_space<vmem>>, vector<1x1x32xbf16>,
    %16 = vector.extract_strided_slice %8 {offsets = [1, 0], sizes = [4, 32], strides = [1, 1]} : vector<5x32xf32> to vector<4x32xf32>
    %17 = arith.addf %7, %16 : vector<4x32xf32>
    %18 = arith.truncf %17 : vector<4x32xf32> to vector<4x32xbf16>
    %c0_13 = arith.constant 0 : index
    %c1 = arith.constant 1 : index
    %c0_14 = arith.constant 0 : index
    %19 = vector.load %arg6[%c0_13, %c1, %c0_14] : memref<1x5x32xbf16, #tpu.memory_space<vmem>>, vector<1x4x32xbf16>
    %20 = vector.shape_cast %19 : vector<1x4x32xbf16> to vector<4x32xbf16>
    %21 = vector.shape_cast %18 : vector<4x32xbf16> to vector<1x4x32xbf16>
    tpu.vector_store %arg6[%c0_13, %c1, %c0_14], %21 {strides = array<i32>} : memref<1x5x32xbf16, #tpu.memory_space<vmem>>, vector<1x4x32xbf16>,
    return
  }
  func.func @transform_0(%arg0: i32) -> (i32, i32, i32) {
    %c0_i32 = arith.constant 0 : i32
    %c0_i32_0 = arith.constant 0 : i32
    %c0_i32_1 = arith.constant 0 : i32
    return %arg0, %c0_i32, %c0_i32_0 : i32, i32, i32
  }
  func.func @transform_1(%arg0: i32) -> (i32, i32) {
    %c0_i32 = arith.constant 0 : i32
    %c0_i32_0 = arith.constant 0 : i32
    %c0_i32_1 = arith.constant 0 : i32
    return %c0_i32, %c0_i32_0 : i32, i32
  }
  func.func @transform_2(%arg0: i32) -> (i32, i32) {
    %c0_i32 = arith.constant 0 : i32
    %c0_i32_0 = arith.constant 0 : i32
    %c0_i32_1 = arith.constant 0 : i32
    return %c0_i32, %c0_i32_0 : i32, i32
  }
  func.func @transform_3(%arg0: i32) -> (i32, i32) {
    %c0_i32 = arith.constant 0 : i32
    %c0_i32_0 = arith.constant 0 : i32
    %c0_i32_1 = arith.constant 0 : i32
    return %c0_i32, %c0_i32_0 : i32, i32
  }
  func.func @transform_4(%arg0: i32) -> (i32, i32) {
    %c0_i32 = arith.constant 0 : i32
    %c0_i32_0 = arith.constant 0 : i32
    %c0_i32_1 = arith.constant 0 : i32
    return %c0_i32, %c0_i32_0 : i32, i32
  }
  func.func @transform_5(%arg0: i32) -> (i32, i32, i32) {
    %c0_i32 = arith.constant 0 : i32
    %c0_i32_0 = arith.constant 0 : i32
    %c0_i32_1 = arith.constant 0 : i32
    return %arg0, %c0_i32, %c0_i32_0 : i32, i32, i32
  }
}

module attributes {stable_mosaic.version = 11 : i64} {
  func.func @_ln_matmul_kernel(%arg0: i32, %arg1: memref<10x32xbf16, #tpu.memory_space<vmem>>, %arg2: memref<1x32xf32, #tpu.memory_space<vmem>>, %arg3: memref<1x32xf32, #tpu.memory_space<vmem>>, %arg4: memref<32x96xbf16, #tpu.memory_space<vmem>>, %arg5: memref<1x96xf32, #tpu.memory_space<vmem>>, %arg6: memref<10x96xbf16, #tpu.memory_space<vmem>>) attributes {dimension_semantics = [#tpu.dimension_semantics<parallel>], iteration_bounds = array<i64: 1>, scalar_prefetch = 0 : i64, scratch_operands = 0 : i64, tpu.core_type = #tpu.core_type<tc>, window_params = [{transform_indices = @transform_0, window_bounds = array<i64: 10, 32>}, {pipeline_mode = #tpu.pipeline_mode<synchronous>, transform_indices = @transform_1, window_bounds = array<i64: 1, 32>}, {pipeline_mode = #tpu.pipeline_mode<synchronous>, transform_indices = @transform_2, window_bounds = array<i64: 1, 32>}, {pipeline_mode = #tpu.pipeline_mode<synchronous>, transform_indices = @transform_3, window_bounds = array<i64: 32, 96>}, {pipeline_mode = #tpu.pipeline_mode<synchronous>, transform_indices = @transform_4, window_bounds = array<i64: 1, 96>}, {transform_indices = @transform_5, window_bounds = array<i64: 10, 96>}]} {
    %c0 = arith.constant 0 : index
    %c0_0 = arith.constant 0 : index
    %0 = vector.load %arg1[%c0, %c0_0] : memref<10x32xbf16, #tpu.memory_space<vmem>>, vector<10x32xbf16>
    %1 = arith.extf %0 : vector<10x32xbf16> to vector<10x32xf32>
    %cst = arith.constant dense<0.000000e+00> : vector<10xf32>
    %2 = vector.multi_reduction <add>, %1, %cst [1] : vector<10x32xf32> to vector<10xf32>
    %3 = vector.shape_cast %2 : vector<10xf32> to vector<10x1xf32>
    %cst_1 = arith.constant 3.200000e+01 : f32
    %4 = vector.broadcast %cst_1 : f32 to vector<10x1xf32>
    %5 = arith.divf %3, %4 : vector<10x1xf32>
    %6 = vector.broadcast %5 : vector<10x1xf32> to vector<10x32xf32>
    %7 = arith.subf %1, %6 : vector<10x32xf32>
    %8 = arith.mulf %7, %7 : vector<10x32xf32>
    %cst_2 = arith.constant dense<0.000000e+00> : vector<10xf32>
    %9 = vector.multi_reduction <add>, %8, %cst_2 [1] : vector<10x32xf32> to vector<10xf32>
    %10 = vector.shape_cast %9 : vector<10xf32> to vector<10x1xf32>
    %cst_3 = arith.constant 3.200000e+01 : f32
    %11 = vector.broadcast %cst_3 : f32 to vector<10x1xf32>
    %12 = arith.divf %10, %11 : vector<10x1xf32>
    %cst_4 = arith.constant 9.99999997E-7 : f32
    %13 = vector.broadcast %cst_4 : f32 to vector<10x1xf32>
    %14 = arith.addf %12, %13 : vector<10x1xf32>
    %15 = math.rsqrt %14 : vector<10x1xf32>
    %16 = vector.broadcast %15 : vector<10x1xf32> to vector<10x32xf32>
    %17 = arith.mulf %7, %16 : vector<10x32xf32>
    %c0_5 = arith.constant 0 : index
    %c0_6 = arith.constant 0 : index
    %18 = vector.load %arg2[%c0_5, %c0_6] : memref<1x32xf32, #tpu.memory_space<vmem>>, vector<1x32xf32>
    %19 = vector.broadcast %18 : vector<1x32xf32> to vector<10x32xf32>
    %20 = arith.mulf %17, %19 : vector<10x32xf32>
    %c0_7 = arith.constant 0 : index
    %c0_8 = arith.constant 0 : index
    %21 = vector.load %arg3[%c0_7, %c0_8] : memref<1x32xf32, #tpu.memory_space<vmem>>, vector<1x32xf32>
    %22 = vector.broadcast %21 : vector<1x32xf32> to vector<10x32xf32>
    %23 = arith.addf %20, %22 : vector<10x32xf32>
    %24 = arith.truncf %23 : vector<10x32xf32> to vector<10x32xbf16>
    %c0_9 = arith.constant 0 : index
    %c0_10 = arith.constant 0 : index
    %25 = vector.load %arg4[%c0_9, %c0_10] : memref<32x96xbf16, #tpu.memory_space<vmem>>, vector<32x96xbf16>
    %cst_11 = arith.constant dense<0.000000e+00> : vector<10x96xf32>
    %26 = tpu.matmul %24, %25, %cst_11 {dimension_numbers = #tpu.dot_dimension_numbers<[1], [0], [0], [1], [0, 0, 1, 1], [], []>} : vector<10x32xbf16>, vector<32x96xbf16>, vector<10x96xf32> -> vector<10x96xf32>
    %c0_12 = arith.constant 0 : index
    %c0_13 = arith.constant 0 : index
    %27 = vector.load %arg5[%c0_12, %c0_13] : memref<1x96xf32, #tpu.memory_space<vmem>>, vector<1x96xf32>
    %28 = vector.broadcast %27 : vector<1x96xf32> to vector<10x96xf32>
    %29 = arith.addf %26, %28 : vector<10x96xf32>
    %30 = arith.truncf %29 : vector<10x96xf32> to vector<10x96xbf16>
    %c0_14 = arith.constant 0 : index
    %c0_15 = arith.constant 0 : index
    %31 = vector.load %arg6[%c0_14, %c0_15] : memref<10x96xbf16, #tpu.memory_space<vmem>>, vector<10x96xbf16>
    tpu.vector_store %arg6[%c0_14, %c0_15], %30 {strides = array<i32>} : memref<10x96xbf16, #tpu.memory_space<vmem>>, vector<10x96xbf16>,
    return
  }
  func.func @transform_0(%arg0: i32) -> (i32, i32) {
    %c0_i32 = arith.constant 0 : i32
    %c0_i32_0 = arith.constant 0 : i32
    return %arg0, %c0_i32 : i32, i32
  }
  func.func @transform_1(%arg0: i32) -> (i32, i32) {
    %c0_i32 = arith.constant 0 : i32
    %c0_i32_0 = arith.constant 0 : i32
    %c0_i32_1 = arith.constant 0 : i32
    return %c0_i32, %c0_i32_0 : i32, i32
  }
  func.func @transform_2(%arg0: i32) -> (i32, i32) {
    %c0_i32 = arith.constant 0 : i32
    %c0_i32_0 = arith.constant 0 : i32
    %c0_i32_1 = arith.constant 0 : i32
    return %c0_i32, %c0_i32_0 : i32, i32
  }
  func.func @transform_3(%arg0: i32) -> (i32, i32) {
    %c0_i32 = arith.constant 0 : i32
    %c0_i32_0 = arith.constant 0 : i32
    %c0_i32_1 = arith.constant 0 : i32
    return %c0_i32, %c0_i32_0 : i32, i32
  }
  func.func @transform_4(%arg0: i32) -> (i32, i32) {
    %c0_i32 = arith.constant 0 : i32
    %c0_i32_0 = arith.constant 0 : i32
    %c0_i32_1 = arith.constant 0 : i32
    return %c0_i32, %c0_i32_0 : i32, i32
  }
  func.func @transform_5(%arg0: i32) -> (i32, i32) {
    %c0_i32 = arith.constant 0 : i32
    %c0_i32_0 = arith.constant 0 : i32
    return %arg0, %c0_i32 : i32, i32
  }
}

module attributes {stable_mosaic.version = 11 : i64} {
  func.func @_attn_kernel(%arg0: i32, %arg1: memref<1x5x96xbf16, #tpu.memory_space<vmem>>, %arg2: memref<32x32xbf16, #tpu.memory_space<vmem>>, %arg3: memref<1x32xf32, #tpu.memory_space<vmem>>, %arg4: memref<1x5x32xbf16, #tpu.memory_space<vmem>>, %arg5: memref<1x5x32xbf16, #tpu.memory_space<vmem>>, %arg6: memref<5x32xf32, #tpu.memory_space<vmem>>) attributes {dimension_semantics = [#tpu.dimension_semantics<parallel>], iteration_bounds = array<i64: 2>, scalar_prefetch = 0 : i64, scratch_operands = 1 : i64, tpu.core_type = #tpu.core_type<tc>, window_params = [{transform_indices = @transform_0, window_bounds = array<i64: 1, 5, 96>}, {pipeline_mode = #tpu.pipeline_mode<synchronous>, transform_indices = @transform_1, window_bounds = array<i64: 32, 32>}, {pipeline_mode = #tpu.pipeline_mode<synchronous>, transform_indices = @transform_2, window_bounds = array<i64: 1, 32>}, {transform_indices = @transform_3, window_bounds = array<i64: 1, 5, 32>}, {transform_indices = @transform_4, window_bounds = array<i64: 1, 5, 32>}]} {
    %c0 = arith.constant 0 : index
    %c0_0 = arith.constant 0 : index
    %c0_1 = arith.constant 0 : index
    %0 = vector.load %arg1[%c0, %c0_0, %c0_1] : memref<1x5x96xbf16, #tpu.memory_space<vmem>>, vector<1x5x96xbf16>
    %1 = vector.shape_cast %0 : vector<1x5x96xbf16> to vector<5x96xbf16>
    %c0_2 = arith.constant 0 : index
    %c0_3 = arith.constant 0 : index
    %c0_4 = arith.constant 0 : index
    %2 = vector.load %arg4[%c0_2, %c0_3, %c0_4] : memref<1x5x32xbf16, #tpu.memory_space<vmem>>, vector<1x5x32xbf16>
    %3 = vector.shape_cast %2 : vector<1x5x32xbf16> to vector<5x32xbf16>
    %4 = arith.extf %3 : vector<5x32xbf16> to vector<5x32xf32>
    %c0_5 = arith.constant 0 : index
    %c0_6 = arith.constant 0 : index
    %5 = vector.load %arg3[%c0_5, %c0_6] : memref<1x32xf32, #tpu.memory_space<vmem>>, vector<1x32xf32>
    %6 = vector.broadcast %5 : vector<1x32xf32> to vector<5x32xf32>
    %7 = arith.addf %4, %6 : vector<5x32xf32>
    %c0_7 = arith.constant 0 : index
    %c0_8 = arith.constant 0 : index
    %8 = vector.load %arg6[%c0_7, %c0_8] : memref<5x32xf32, #tpu.memory_space<vmem>>, vector<5x32xf32>
    tpu.vector_store %arg6[%c0_7, %c0_8], %7 {strides = array<i32>} : memref<5x32xf32, #tpu.memory_space<vmem>>, vector<5x32xf32>,
    %9 = vector.extract_strided_slice %1 {offsets = [0, 0], sizes = [5, 8], strides = [1, 1]} : vector<5x96xbf16> to vector<5x8xbf16>
    %10 = arith.extf %9 : vector<5x8xbf16> to vector<5x8xf32>
    %cst = arith.constant 0.353553385 : f32
    %11 = vector.broadcast %cst : f32 to vector<5x8xf32>
    %12 = arith.mulf %10, %11 : vector<5x8xf32>
    %13 = arith.truncf %12 : vector<5x8xf32> to vector<5x8xbf16>
    %14 = vector.extract_strided_slice %1 {offsets = [0, 32], sizes = [5, 8], strides = [1, 1]} : vector<5x96xbf16> to vector<5x8xbf16>
    %15 = vector.extract_strided_slice %1 {offsets = [0, 64], sizes = [5, 8], strides = [1, 1]} : vector<5x96xbf16> to vector<5x8xbf16>
    %cst_9 = arith.constant dense<0.000000e+00> : vector<5x5xf32>
    %16 = tpu.matmul %13, %14, %cst_9 {dimension_numbers = #tpu.dot_dimension_numbers<[1], [1], [0], [0], [0, 0, 1, 0], [], []>} : vector<5x8xbf16>, vector<5x8xbf16>, vector<5x5xf32> -> vector<5x5xf32>
    %cst_10 = arith.constant dense<0xFF800000> : vector<5xf32>
    %17 = vector.multi_reduction <maximumf>, %16, %cst_10 [1] : vector<5x5xf32> to vector<5xf32>
    %18 = vector.shape_cast %17 : vector<5xf32> to vector<5x1xf32>
    %19 = vector.broadcast %18 : vector<5x1xf32> to vector<5x5xf32>
    %20 = arith.subf %16, %19 : vector<5x5xf32>
    %21 = math.exp %20 : vector<5x5xf32>
    %cst_11 = arith.constant dense<0.000000e+00> : vector<5xf32>
    %22 = vector.multi_reduction <add>, %21, %cst_11 [1] : vector<5x5xf32> to vector<5xf32>
    %23 = vector.shape_cast %22 : vector<5xf32> to vector<5x1xf32>
    %24 = tpu.reciprocal %23 {approx = true} : vector<5x1xf32> -> vector<5x1xf32>
    %25 = arith.truncf %21 : vector<5x5xf32> to vector<5x5xbf16>
    %cst_12 = arith.constant dense<0.000000e+00> : vector<5x8xf32>
    %26 = tpu.matmul %25, %15, %cst_12 {dimension_numbers = #tpu.dot_dimension_numbers<[1], [0], [0], [1], [0, 0, 1, 1], [], []>} : vector<5x5xbf16>, vector<5x8xbf16>, vector<5x8xf32> -> vector<5x8xf32>
    %27 = vector.broadcast %24 : vector<5x1xf32> to vector<5x8xf32>
    %28 = arith.mulf %26, %27 : vector<5x8xf32>
    %c0_13 = arith.constant 0 : index
    %c0_14 = arith.constant 0 : index
    %29 = vector.load %arg6[%c0_13, %c0_14] : memref<5x32xf32, #tpu.memory_space<vmem>>, vector<5x32xf32>
    %30 = arith.truncf %28 : vector<5x8xf32> to vector<5x8xbf16>
    %c0_15 = arith.constant 0 : index
    %c0_16 = arith.constant 0 : index
    %31 = vector.load %arg2[%c0_15, %c0_16] : memref<32x32xbf16, #tpu.memory_space<vmem>>, vector<8x32xbf16>
    %cst_17 = arith.constant dense<0.000000e+00> : vector<5x32xf32>
    %32 = tpu.matmul %30, %31, %cst_17 {dimension_numbers = #tpu.dot_dimension_numbers<[1], [0], [0], [1], [0, 0, 1, 1], [], []>} : vector<5x8xbf16>, vector<8x32xbf16>, vector<5x32xf32> -> vector<5x32xf32>
    %33 = arith.addf %29, %32 : vector<5x32xf32>
    %c0_18 = arith.constant 0 : index
    %c0_19 = arith.constant 0 : index
    %34 = vector.load %arg6[%c0_18, %c0_19] : memref<5x32xf32, #tpu.memory_space<vmem>>, vector<5x32xf32>
    tpu.vector_store %arg6[%c0_18, %c0_19], %33 {strides = array<i32>} : memref<5x32xf32, #tpu.memory_space<vmem>>, vector<5x32xf32>,
    %35 = vector.extract_strided_slice %1 {offsets = [0, 8], sizes = [5, 8], strides = [1, 1]} : vector<5x96xbf16> to vector<5x8xbf16>
    %36 = arith.extf %35 : vector<5x8xbf16> to vector<5x8xf32>
    %cst_20 = arith.constant 0.353553385 : f32
    %37 = vector.broadcast %cst_20 : f32 to vector<5x8xf32>
    %38 = arith.mulf %36, %37 : vector<5x8xf32>
    %39 = arith.truncf %38 : vector<5x8xf32> to vector<5x8xbf16>
    %40 = vector.extract_strided_slice %1 {offsets = [0, 40], sizes = [5, 8], strides = [1, 1]} : vector<5x96xbf16> to vector<5x8xbf16>
    %41 = vector.extract_strided_slice %1 {offsets = [0, 72], sizes = [5, 8], strides = [1, 1]} : vector<5x96xbf16> to vector<5x8xbf16>
    %cst_21 = arith.constant dense<0.000000e+00> : vector<5x5xf32>
    %42 = tpu.matmul %39, %40, %cst_21 {dimension_numbers = #tpu.dot_dimension_numbers<[1], [1], [0], [0], [0, 0, 1, 0], [], []>} : vector<5x8xbf16>, vector<5x8xbf16>, vector<5x5xf32> -> vector<5x5xf32>
    %cst_22 = arith.constant dense<0xFF800000> : vector<5xf32>
    %43 = vector.multi_reduction <maximumf>, %42, %cst_22 [1] : vector<5x5xf32> to vector<5xf32>
    %44 = vector.shape_cast %43 : vector<5xf32> to vector<5x1xf32>
    %45 = vector.broadcast %44 : vector<5x1xf32> to vector<5x5xf32>
    %46 = arith.subf %42, %45 : vector<5x5xf32>
    %47 = math.exp %46 : vector<5x5xf32>
    %cst_23 = arith.constant dense<0.000000e+00> : vector<5xf32>
    %48 = vector.multi_reduction <add>, %47, %cst_23 [1] : vector<5x5xf32> to vector<5xf32>
    %49 = vector.shape_cast %48 : vector<5xf32> to vector<5x1xf32>
    %50 = tpu.reciprocal %49 {approx = true} : vector<5x1xf32> -> vector<5x1xf32>
    %51 = arith.truncf %47 : vector<5x5xf32> to vector<5x5xbf16>
    %cst_24 = arith.constant dense<0.000000e+00> : vector<5x8xf32>
    %52 = tpu.matmul %51, %41, %cst_24 {dimension_numbers = #tpu.dot_dimension_numbers<[1], [0], [0], [1], [0, 0, 1, 1], [], []>} : vector<5x5xbf16>, vector<5x8xbf16>, vector<5x8xf32> -> vector<5x8xf32>
    %53 = vector.broadcast %50 : vector<5x1xf32> to vector<5x8xf32>
    %54 = arith.mulf %52, %53 : vector<5x8xf32>
    %c0_25 = arith.constant 0 : index
    %c0_26 = arith.constant 0 : index
    %55 = vector.load %arg6[%c0_25, %c0_26] : memref<5x32xf32, #tpu.memory_space<vmem>>, vector<5x32xf32>
    %56 = arith.truncf %54 : vector<5x8xf32> to vector<5x8xbf16>
    %c8 = arith.constant 8 : index
    %c0_27 = arith.constant 0 : index
    %57 = vector.load %arg2[%c8, %c0_27] : memref<32x32xbf16, #tpu.memory_space<vmem>>, vector<8x32xbf16>
    %cst_28 = arith.constant dense<0.000000e+00> : vector<5x32xf32>
    %58 = tpu.matmul %56, %57, %cst_28 {dimension_numbers = #tpu.dot_dimension_numbers<[1], [0], [0], [1], [0, 0, 1, 1], [], []>} : vector<5x8xbf16>, vector<8x32xbf16>, vector<5x32xf32> -> vector<5x32xf32>
    %59 = arith.addf %55, %58 : vector<5x32xf32>
    %c0_29 = arith.constant 0 : index
    %c0_30 = arith.constant 0 : index
    %60 = vector.load %arg6[%c0_29, %c0_30] : memref<5x32xf32, #tpu.memory_space<vmem>>, vector<5x32xf32>
    tpu.vector_store %arg6[%c0_29, %c0_30], %59 {strides = array<i32>} : memref<5x32xf32, #tpu.memory_space<vmem>>, vector<5x32xf32>,
    %61 = vector.extract_strided_slice %1 {offsets = [0, 16], sizes = [5, 8], strides = [1, 1]} : vector<5x96xbf16> to vector<5x8xbf16>
    %62 = arith.extf %61 : vector<5x8xbf16> to vector<5x8xf32>
    %cst_31 = arith.constant 0.353553385 : f32
    %63 = vector.broadcast %cst_31 : f32 to vector<5x8xf32>
    %64 = arith.mulf %62, %63 : vector<5x8xf32>
    %65 = arith.truncf %64 : vector<5x8xf32> to vector<5x8xbf16>
    %66 = vector.extract_strided_slice %1 {offsets = [0, 48], sizes = [5, 8], strides = [1, 1]} : vector<5x96xbf16> to vector<5x8xbf16>
    %67 = vector.extract_strided_slice %1 {offsets = [0, 80], sizes = [5, 8], strides = [1, 1]} : vector<5x96xbf16> to vector<5x8xbf16>
    %cst_32 = arith.constant dense<0.000000e+00> : vector<5x5xf32>
    %68 = tpu.matmul %65, %66, %cst_32 {dimension_numbers = #tpu.dot_dimension_numbers<[1], [1], [0], [0], [0, 0, 1, 0], [], []>} : vector<5x8xbf16>, vector<5x8xbf16>, vector<5x5xf32> -> vector<5x5xf32>
    %cst_33 = arith.constant dense<0xFF800000> : vector<5xf32>
    %69 = vector.multi_reduction <maximumf>, %68, %cst_33 [1] : vector<5x5xf32> to vector<5xf32>
    %70 = vector.shape_cast %69 : vector<5xf32> to vector<5x1xf32>
    %71 = vector.broadcast %70 : vector<5x1xf32> to vector<5x5xf32>
    %72 = arith.subf %68, %71 : vector<5x5xf32>
    %73 = math.exp %72 : vector<5x5xf32>
    %cst_34 = arith.constant dense<0.000000e+00> : vector<5xf32>
    %74 = vector.multi_reduction <add>, %73, %cst_34 [1] : vector<5x5xf32> to vector<5xf32>
    %75 = vector.shape_cast %74 : vector<5xf32> to vector<5x1xf32>
    %76 = tpu.reciprocal %75 {approx = true} : vector<5x1xf32> -> vector<5x1xf32>
    %77 = arith.truncf %73 : vector<5x5xf32> to vector<5x5xbf16>
    %cst_35 = arith.constant dense<0.000000e+00> : vector<5x8xf32>
    %78 = tpu.matmul %77, %67, %cst_35 {dimension_numbers = #tpu.dot_dimension_numbers<[1], [0], [0], [1], [0, 0, 1, 1], [], []>} : vector<5x5xbf16>, vector<5x8xbf16>, vector<5x8xf32> -> vector<5x8xf32>
    %79 = vector.broadcast %76 : vector<5x1xf32> to vector<5x8xf32>
    %80 = arith.mulf %78, %79 : vector<5x8xf32>
    %c0_36 = arith.constant 0 : index
    %c0_37 = arith.constant 0 : index
    %81 = vector.load %arg6[%c0_36, %c0_37] : memref<5x32xf32, #tpu.memory_space<vmem>>, vector<5x32xf32>
    %82 = arith.truncf %80 : vector<5x8xf32> to vector<5x8xbf16>
    %c16 = arith.constant 16 : index
    %c0_38 = arith.constant 0 : index
    %83 = vector.load %arg2[%c16, %c0_38] : memref<32x32xbf16, #tpu.memory_space<vmem>>, vector<8x32xbf16>
    %cst_39 = arith.constant dense<0.000000e+00> : vector<5x32xf32>
    %84 = tpu.matmul %82, %83, %cst_39 {dimension_numbers = #tpu.dot_dimension_numbers<[1], [0], [0], [1], [0, 0, 1, 1], [], []>} : vector<5x8xbf16>, vector<8x32xbf16>, vector<5x32xf32> -> vector<5x32xf32>
    %85 = arith.addf %81, %84 : vector<5x32xf32>
    %c0_40 = arith.constant 0 : index
    %c0_41 = arith.constant 0 : index
    %86 = vector.load %arg6[%c0_40, %c0_41] : memref<5x32xf32, #tpu.memory_space<vmem>>, vector<5x32xf32>
    tpu.vector_store %arg6[%c0_40, %c0_41], %85 {strides = array<i32>} : memref<5x32xf32, #tpu.memory_space<vmem>>, vector<5x32xf32>,
    %87 = vector.extract_strided_slice %1 {offsets = [0, 24], sizes = [5, 8], strides = [1, 1]} : vector<5x96xbf16> to vector<5x8xbf16>
    %88 = arith.extf %87 : vector<5x8xbf16> to vector<5x8xf32>
    %cst_42 = arith.constant 0.353553385 : f32
    %89 = vector.broadcast %cst_42 : f32 to vector<5x8xf32>
    %90 = arith.mulf %88, %89 : vector<5x8xf32>
    %91 = arith.truncf %90 : vector<5x8xf32> to vector<5x8xbf16>
    %92 = vector.extract_strided_slice %1 {offsets = [0, 56], sizes = [5, 8], strides = [1, 1]} : vector<5x96xbf16> to vector<5x8xbf16>
    %93 = vector.extract_strided_slice %1 {offsets = [0, 88], sizes = [5, 8], strides = [1, 1]} : vector<5x96xbf16> to vector<5x8xbf16>
    %cst_43 = arith.constant dense<0.000000e+00> : vector<5x5xf32>
    %94 = tpu.matmul %91, %92, %cst_43 {dimension_numbers = #tpu.dot_dimension_numbers<[1], [1], [0], [0], [0, 0, 1, 0], [], []>} : vector<5x8xbf16>, vector<5x8xbf16>, vector<5x5xf32> -> vector<5x5xf32>
    %cst_44 = arith.constant dense<0xFF800000> : vector<5xf32>
    %95 = vector.multi_reduction <maximumf>, %94, %cst_44 [1] : vector<5x5xf32> to vector<5xf32>
    %96 = vector.shape_cast %95 : vector<5xf32> to vector<5x1xf32>
    %97 = vector.broadcast %96 : vector<5x1xf32> to vector<5x5xf32>
    %98 = arith.subf %94, %97 : vector<5x5xf32>
    %99 = math.exp %98 : vector<5x5xf32>
    %cst_45 = arith.constant dense<0.000000e+00> : vector<5xf32>
    %100 = vector.multi_reduction <add>, %99, %cst_45 [1] : vector<5x5xf32> to vector<5xf32>
    %101 = vector.shape_cast %100 : vector<5xf32> to vector<5x1xf32>
    %102 = tpu.reciprocal %101 {approx = true} : vector<5x1xf32> -> vector<5x1xf32>
    %103 = arith.truncf %99 : vector<5x5xf32> to vector<5x5xbf16>
    %cst_46 = arith.constant dense<0.000000e+00> : vector<5x8xf32>
    %104 = tpu.matmul %103, %93, %cst_46 {dimension_numbers = #tpu.dot_dimension_numbers<[1], [0], [0], [1], [0, 0, 1, 1], [], []>} : vector<5x5xbf16>, vector<5x8xbf16>, vector<5x8xf32> -> vector<5x8xf32>
    %105 = vector.broadcast %102 : vector<5x1xf32> to vector<5x8xf32>
    %106 = arith.mulf %104, %105 : vector<5x8xf32>
    %c0_47 = arith.constant 0 : index
    %c0_48 = arith.constant 0 : index
    %107 = vector.load %arg6[%c0_47, %c0_48] : memref<5x32xf32, #tpu.memory_space<vmem>>, vector<5x32xf32>
    %108 = arith.truncf %106 : vector<5x8xf32> to vector<5x8xbf16>
    %c24 = arith.constant 24 : index
    %c0_49 = arith.constant 0 : index
    %109 = vector.load %arg2[%c24, %c0_49] : memref<32x32xbf16, #tpu.memory_space<vmem>>, vector<8x32xbf16>
    %cst_50 = arith.constant dense<0.000000e+00> : vector<5x32xf32>
    %110 = tpu.matmul %108, %109, %cst_50 {dimension_numbers = #tpu.dot_dimension_numbers<[1], [0], [0], [1], [0, 0, 1, 1], [], []>} : vector<5x8xbf16>, vector<8x32xbf16>, vector<5x32xf32> -> vector<5x32xf32>
    %111 = arith.addf %107, %110 : vector<5x32xf32>
    %c0_51 = arith.constant 0 : index
    %c0_52 = arith.constant 0 : index
    %112 = vector.load %arg6[%c0_51, %c0_52] : memref<5x32xf32, #tpu.memory_space<vmem>>, vector<5x32xf32>
    tpu.vector_store %arg6[%c0_51, %c0_52], %111 {strides = array<i32>} : memref<5x32xf32, #tpu.memory_space<vmem>>, vector<5x32xf32>,
    %c0_53 = arith.constant 0 : index
    %c0_54 = arith.constant 0 : index
    %113 = vector.load %arg6[%c0_53, %c0_54] : memref<5x32xf32, #tpu.memory_space<vmem>>, vector<5x32xf32>
    %114 = arith.truncf %113 : vector<5x32xf32> to vector<5x32xbf16>
    %c0_55 = arith.constant 0 : index
    %c0_56 = arith.constant 0 : index
    %c0_57 = arith.constant 0 : index
    %115 = vector.load %arg5[%c0_55, %c0_56, %c0_57] : memref<1x5x32xbf16, #tpu.memory_space<vmem>>, vector<1x5x32xbf16>
    %116 = vector.shape_cast %115 : vector<1x5x32xbf16> to vector<5x32xbf16>
    %117 = vector.shape_cast %114 : vector<5x32xbf16> to vector<1x5x32xbf16>
    tpu.vector_store %arg5[%c0_55, %c0_56, %c0_57], %117 {strides = array<i32>} : memref<1x5x32xbf16, #tpu.memory_space<vmem>>, vector<1x5x32xbf16>,
    return
  }
  func.func @transform_0(%arg0: i32) -> (i32, i32, i32) {
    %c0_i32 = arith.constant 0 : i32
    %c0_i32_0 = arith.constant 0 : i32
    %c0_i32_1 = arith.constant 0 : i32
    return %arg0, %c0_i32, %c0_i32_0 : i32, i32, i32
  }
  func.func @transform_1(%arg0: i32) -> (i32, i32) {
    %c0_i32 = arith.constant 0 : i32
    %c0_i32_0 = arith.constant 0 : i32
    %c0_i32_1 = arith.constant 0 : i32
    return %c0_i32, %c0_i32_0 : i32, i32
  }
  func.func @transform_2(%arg0: i32) -> (i32, i32) {
    %c0_i32 = arith.constant 0 : i32
    %c0_i32_0 = arith.constant 0 : i32
    %c0_i32_1 = arith.constant 0 : i32
    return %c0_i32, %c0_i32_0 : i32, i32
  }
  func.func @transform_3(%arg0: i32) -> (i32, i32, i32) {
    %c0_i32 = arith.constant 0 : i32
    %c0_i32_0 = arith.constant 0 : i32
    %c0_i32_1 = arith.constant 0 : i32
    return %arg0, %c0_i32, %c0_i32_0 : i32, i32, i32
  }
  func.func @transform_4(%arg0: i32) -> (i32, i32, i32) {
    %c0_i32 = arith.constant 0 : i32
    %c0_i32_0 = arith.constant 0 : i32
    %c0_i32_1 = arith.constant 0 : i32
    return %arg0, %c0_i32, %c0_i32_0 : i32, i32, i32
  }
}

module attributes {stable_mosaic.version = 11 : i64} {
  func.func @_mlp_kernel(%arg0: i32, %arg1: memref<10x32xbf16, #tpu.memory_space<vmem>>, %arg2: memref<1x32xf32, #tpu.memory_space<vmem>>, %arg3: memref<1x32xf32, #tpu.memory_space<vmem>>, %arg4: memref<32x128xbf16, #tpu.memory_space<vmem>>, %arg5: memref<1x128xf32, #tpu.memory_space<vmem>>, %arg6: memref<128x32xbf16, #tpu.memory_space<vmem>>, %arg7: memref<1x32xf32, #tpu.memory_space<vmem>>, %arg8: memref<10x32xbf16, #tpu.memory_space<vmem>>) attributes {dimension_semantics = [#tpu.dimension_semantics<parallel>], iteration_bounds = array<i64: 1>, scalar_prefetch = 0 : i64, scratch_operands = 0 : i64, tpu.core_type = #tpu.core_type<tc>, window_params = [{transform_indices = @transform_0, window_bounds = array<i64: 10, 32>}, {pipeline_mode = #tpu.pipeline_mode<synchronous>, transform_indices = @transform_1, window_bounds = array<i64: 1, 32>}, {pipeline_mode = #tpu.pipeline_mode<synchronous>, transform_indices = @transform_2, window_bounds = array<i64: 1, 32>}, {pipeline_mode = #tpu.pipeline_mode<synchronous>, transform_indices = @transform_3, window_bounds = array<i64: 32, 128>}, {pipeline_mode = #tpu.pipeline_mode<synchronous>, transform_indices = @transform_4, window_bounds = array<i64: 1, 128>}, {pipeline_mode = #tpu.pipeline_mode<synchronous>, transform_indices = @transform_5, window_bounds = array<i64: 128, 32>}, {pipeline_mode = #tpu.pipeline_mode<synchronous>, transform_indices = @transform_6, window_bounds = array<i64: 1, 32>}, {transform_indices = @transform_7, window_bounds = array<i64: 10, 32>}]} {
    %c0 = arith.constant 0 : index
    %c0_0 = arith.constant 0 : index
    %0 = vector.load %arg1[%c0, %c0_0] : memref<10x32xbf16, #tpu.memory_space<vmem>>, vector<10x32xbf16>
    %1 = arith.extf %0 : vector<10x32xbf16> to vector<10x32xf32>
    %cst = arith.constant dense<0.000000e+00> : vector<10xf32>
    %2 = vector.multi_reduction <add>, %1, %cst [1] : vector<10x32xf32> to vector<10xf32>
    %3 = vector.shape_cast %2 : vector<10xf32> to vector<10x1xf32>
    %cst_1 = arith.constant 3.200000e+01 : f32
    %4 = vector.broadcast %cst_1 : f32 to vector<10x1xf32>
    %5 = arith.divf %3, %4 : vector<10x1xf32>
    %6 = vector.broadcast %5 : vector<10x1xf32> to vector<10x32xf32>
    %7 = arith.subf %1, %6 : vector<10x32xf32>
    %8 = arith.mulf %7, %7 : vector<10x32xf32>
    %cst_2 = arith.constant dense<0.000000e+00> : vector<10xf32>
    %9 = vector.multi_reduction <add>, %8, %cst_2 [1] : vector<10x32xf32> to vector<10xf32>
    %10 = vector.shape_cast %9 : vector<10xf32> to vector<10x1xf32>
    %cst_3 = arith.constant 3.200000e+01 : f32
    %11 = vector.broadcast %cst_3 : f32 to vector<10x1xf32>
    %12 = arith.divf %10, %11 : vector<10x1xf32>
    %cst_4 = arith.constant 9.99999997E-7 : f32
    %13 = vector.broadcast %cst_4 : f32 to vector<10x1xf32>
    %14 = arith.addf %12, %13 : vector<10x1xf32>
    %15 = math.rsqrt %14 : vector<10x1xf32>
    %16 = vector.broadcast %15 : vector<10x1xf32> to vector<10x32xf32>
    %17 = arith.mulf %7, %16 : vector<10x32xf32>
    %c0_5 = arith.constant 0 : index
    %c0_6 = arith.constant 0 : index
    %18 = vector.load %arg2[%c0_5, %c0_6] : memref<1x32xf32, #tpu.memory_space<vmem>>, vector<1x32xf32>
    %19 = vector.broadcast %18 : vector<1x32xf32> to vector<10x32xf32>
    %20 = arith.mulf %17, %19 : vector<10x32xf32>
    %c0_7 = arith.constant 0 : index
    %c0_8 = arith.constant 0 : index
    %21 = vector.load %arg3[%c0_7, %c0_8] : memref<1x32xf32, #tpu.memory_space<vmem>>, vector<1x32xf32>
    %22 = vector.broadcast %21 : vector<1x32xf32> to vector<10x32xf32>
    %23 = arith.addf %20, %22 : vector<10x32xf32>
    %24 = arith.truncf %23 : vector<10x32xf32> to vector<10x32xbf16>
    %c0_9 = arith.constant 0 : index
    %c0_10 = arith.constant 0 : index
    %25 = vector.load %arg4[%c0_9, %c0_10] : memref<32x128xbf16, #tpu.memory_space<vmem>>, vector<32x128xbf16>
    %cst_11 = arith.constant dense<0.000000e+00> : vector<10x128xf32>
    %26 = tpu.matmul %24, %25, %cst_11 {dimension_numbers = #tpu.dot_dimension_numbers<[1], [0], [0], [1], [0, 0, 1, 1], [], []>} : vector<10x32xbf16>, vector<32x128xbf16>, vector<10x128xf32> -> vector<10x128xf32>
    %c0_12 = arith.constant 0 : index
    %c0_13 = arith.constant 0 : index
    %27 = vector.load %arg5[%c0_12, %c0_13] : memref<1x128xf32, #tpu.memory_space<vmem>>, vector<1x128xf32>
    %28 = vector.broadcast %27 : vector<1x128xf32> to vector<10x128xf32>
    %29 = arith.addf %26, %28 : vector<10x128xf32>
    %30 = arith.mulf %29, %29 : vector<10x128xf32>
    %31 = arith.mulf %29, %30 : vector<10x128xf32>
    %cst_14 = arith.constant 4.471500e-02 : f32
    %32 = vector.broadcast %cst_14 : f32 to vector<10x128xf32>
    %33 = arith.mulf %32, %31 : vector<10x128xf32>
    %34 = arith.addf %29, %33 : vector<10x128xf32>
    %cst_15 = arith.constant 0.797884583 : f32
    %35 = vector.broadcast %cst_15 : f32 to vector<10x128xf32>
    %36 = arith.mulf %35, %34 : vector<10x128xf32>
    %37 = math.tanh %36 : vector<10x128xf32>
    %cst_16 = arith.constant 1.000000e+00 : f32
    %38 = vector.broadcast %cst_16 : f32 to vector<10x128xf32>
    %39 = arith.addf %38, %37 : vector<10x128xf32>
    %cst_17 = arith.constant 5.000000e-01 : f32
    %40 = vector.broadcast %cst_17 : f32 to vector<10x128xf32>
    %41 = arith.mulf %40, %39 : vector<10x128xf32>
    %42 = arith.mulf %29, %41 : vector<10x128xf32>
    %43 = arith.truncf %42 : vector<10x128xf32> to vector<10x128xbf16>
    %c0_18 = arith.constant 0 : index
    %c0_19 = arith.constant 0 : index
    %44 = vector.load %arg6[%c0_18, %c0_19] : memref<128x32xbf16, #tpu.memory_space<vmem>>, vector<128x32xbf16>
    %cst_20 = arith.constant dense<0.000000e+00> : vector<10x32xf32>
    %45 = tpu.matmul %43, %44, %cst_20 {dimension_numbers = #tpu.dot_dimension_numbers<[1], [0], [0], [1], [0, 0, 1, 1], [], []>} : vector<10x128xbf16>, vector<128x32xbf16>, vector<10x32xf32> -> vector<10x32xf32>
    %c0_21 = arith.constant 0 : index
    %c0_22 = arith.constant 0 : index
    %46 = vector.load %arg7[%c0_21, %c0_22] : memref<1x32xf32, #tpu.memory_space<vmem>>, vector<1x32xf32>
    %47 = vector.broadcast %46 : vector<1x32xf32> to vector<10x32xf32>
    %48 = arith.addf %45, %47 : vector<10x32xf32>
    %49 = arith.addf %48, %1 : vector<10x32xf32>
    %50 = arith.truncf %49 : vector<10x32xf32> to vector<10x32xbf16>
    %c0_23 = arith.constant 0 : index
    %c0_24 = arith.constant 0 : index
    %51 = vector.load %arg8[%c0_23, %c0_24] : memref<10x32xbf16, #tpu.memory_space<vmem>>, vector<10x32xbf16>
    tpu.vector_store %arg8[%c0_23, %c0_24], %50 {strides = array<i32>} : memref<10x32xbf16, #tpu.memory_space<vmem>>, vector<10x32xbf16>,
    return
  }
  func.func @transform_0(%arg0: i32) -> (i32, i32) {
    %c0_i32 = arith.constant 0 : i32
    %c0_i32_0 = arith.constant 0 : i32
    return %arg0, %c0_i32 : i32, i32
  }
  func.func @transform_1(%arg0: i32) -> (i32, i32) {
    %c0_i32 = arith.constant 0 : i32
    %c0_i32_0 = arith.constant 0 : i32
    %c0_i32_1 = arith.constant 0 : i32
    return %c0_i32, %c0_i32_0 : i32, i32
  }
  func.func @transform_2(%arg0: i32) -> (i32, i32) {
    %c0_i32 = arith.constant 0 : i32
    %c0_i32_0 = arith.constant 0 : i32
    %c0_i32_1 = arith.constant 0 : i32
    return %c0_i32, %c0_i32_0 : i32, i32
  }
  func.func @transform_3(%arg0: i32) -> (i32, i32) {
    %c0_i32 = arith.constant 0 : i32
    %c0_i32_0 = arith.constant 0 : i32
    %c0_i32_1 = arith.constant 0 : i32
    return %c0_i32, %c0_i32_0 : i32, i32
  }
  func.func @transform_4(%arg0: i32) -> (i32, i32) {
    %c0_i32 = arith.constant 0 : i32
    %c0_i32_0 = arith.constant 0 : i32
    %c0_i32_1 = arith.constant 0 : i32
    return %c0_i32, %c0_i32_0 : i32, i32
  }
  func.func @transform_5(%arg0: i32) -> (i32, i32) {
    %c0_i32 = arith.constant 0 : i32
    %c0_i32_0 = arith.constant 0 : i32
    %c0_i32_1 = arith.constant 0 : i32
    return %c0_i32, %c0_i32_0 : i32, i32
  }
  func.func @transform_6(%arg0: i32) -> (i32, i32) {
    %c0_i32 = arith.constant 0 : i32
    %c0_i32_0 = arith.constant 0 : i32
    %c0_i32_1 = arith.constant 0 : i32
    return %c0_i32, %c0_i32_0 : i32, i32
  }
  func.func @transform_7(%arg0: i32) -> (i32, i32) {
    %c0_i32 = arith.constant 0 : i32
    %c0_i32_0 = arith.constant 0 : i32
    return %arg0, %c0_i32 : i32, i32
  }
}

module attributes {stable_mosaic.version = 11 : i64} {
  func.func @_heads_kernel(%arg0: i32, %arg1: memref<10x32xbf16, #tpu.memory_space<vmem>>, %arg2: memref<1x32xf32, #tpu.memory_space<vmem>>, %arg3: memref<1x32xf32, #tpu.memory_space<vmem>>, %arg4: memref<32x128xbf16, #tpu.memory_space<vmem>>, %arg5: memref<1x128xf32, #tpu.memory_space<vmem>>, %arg6: memref<128x1xbf16, #tpu.memory_space<vmem>>, %arg7: memref<1x1xf32, #tpu.memory_space<vmem>>, %arg8: memref<32x1xbf16, #tpu.memory_space<vmem>>, %arg9: memref<1x1xf32, #tpu.memory_space<vmem>>, %arg10: memref<10x2xf32, #tpu.memory_space<vmem>>) attributes {dimension_semantics = [#tpu.dimension_semantics<parallel>], iteration_bounds = array<i64: 1>, scalar_prefetch = 0 : i64, scratch_operands = 0 : i64, tpu.core_type = #tpu.core_type<tc>, window_params = [{transform_indices = @transform_0, window_bounds = array<i64: 10, 32>}, {pipeline_mode = #tpu.pipeline_mode<synchronous>, transform_indices = @transform_1, window_bounds = array<i64: 1, 32>}, {pipeline_mode = #tpu.pipeline_mode<synchronous>, transform_indices = @transform_2, window_bounds = array<i64: 1, 32>}, {pipeline_mode = #tpu.pipeline_mode<synchronous>, transform_indices = @transform_3, window_bounds = array<i64: 32, 128>}, {pipeline_mode = #tpu.pipeline_mode<synchronous>, transform_indices = @transform_4, window_bounds = array<i64: 1, 128>}, {pipeline_mode = #tpu.pipeline_mode<synchronous>, transform_indices = @transform_5, window_bounds = array<i64: 128, 1>}, {pipeline_mode = #tpu.pipeline_mode<synchronous>, transform_indices = @transform_6, window_bounds = array<i64: 1, 1>}, {pipeline_mode = #tpu.pipeline_mode<synchronous>, transform_indices = @transform_7, window_bounds = array<i64: 32, 1>}, {pipeline_mode = #tpu.pipeline_mode<synchronous>, transform_indices = @transform_8, window_bounds = array<i64: 1, 1>}, {transform_indices = @transform_9, window_bounds = array<i64: 10, 2>}]} {
    %c0 = arith.constant 0 : index
    %c0_0 = arith.constant 0 : index
    %0 = vector.load %arg1[%c0, %c0_0] : memref<10x32xbf16, #tpu.memory_space<vmem>>, vector<10x32xbf16>
    %1 = arith.extf %0 : vector<10x32xbf16> to vector<10x32xf32>
    %cst = arith.constant dense<0.000000e+00> : vector<10xf32>
    %2 = vector.multi_reduction <add>, %1, %cst [1] : vector<10x32xf32> to vector<10xf32>
    %3 = vector.shape_cast %2 : vector<10xf32> to vector<10x1xf32>
    %cst_1 = arith.constant 3.200000e+01 : f32
    %4 = vector.broadcast %cst_1 : f32 to vector<10x1xf32>
    %5 = arith.divf %3, %4 : vector<10x1xf32>
    %6 = vector.broadcast %5 : vector<10x1xf32> to vector<10x32xf32>
    %7 = arith.subf %1, %6 : vector<10x32xf32>
    %8 = arith.mulf %7, %7 : vector<10x32xf32>
    %cst_2 = arith.constant dense<0.000000e+00> : vector<10xf32>
    %9 = vector.multi_reduction <add>, %8, %cst_2 [1] : vector<10x32xf32> to vector<10xf32>
    %10 = vector.shape_cast %9 : vector<10xf32> to vector<10x1xf32>
    %cst_3 = arith.constant 3.200000e+01 : f32
    %11 = vector.broadcast %cst_3 : f32 to vector<10x1xf32>
    %12 = arith.divf %10, %11 : vector<10x1xf32>
    %cst_4 = arith.constant 9.99999997E-7 : f32
    %13 = vector.broadcast %cst_4 : f32 to vector<10x1xf32>
    %14 = arith.addf %12, %13 : vector<10x1xf32>
    %15 = math.rsqrt %14 : vector<10x1xf32>
    %16 = vector.broadcast %15 : vector<10x1xf32> to vector<10x32xf32>
    %17 = arith.mulf %7, %16 : vector<10x32xf32>
    %c0_5 = arith.constant 0 : index
    %c0_6 = arith.constant 0 : index
    %18 = vector.load %arg2[%c0_5, %c0_6] : memref<1x32xf32, #tpu.memory_space<vmem>>, vector<1x32xf32>
    %19 = vector.broadcast %18 : vector<1x32xf32> to vector<10x32xf32>
    %20 = arith.mulf %17, %19 : vector<10x32xf32>
    %c0_7 = arith.constant 0 : index
    %c0_8 = arith.constant 0 : index
    %21 = vector.load %arg3[%c0_7, %c0_8] : memref<1x32xf32, #tpu.memory_space<vmem>>, vector<1x32xf32>
    %22 = vector.broadcast %21 : vector<1x32xf32> to vector<10x32xf32>
    %23 = arith.addf %20, %22 : vector<10x32xf32>
    %24 = arith.truncf %23 : vector<10x32xf32> to vector<10x32xbf16>
    %c0_9 = arith.constant 0 : index
    %c0_10 = arith.constant 0 : index
    %25 = vector.load %arg4[%c0_9, %c0_10] : memref<32x128xbf16, #tpu.memory_space<vmem>>, vector<32x128xbf16>
    %cst_11 = arith.constant dense<0.000000e+00> : vector<10x128xf32>
    %26 = tpu.matmul %24, %25, %cst_11 {dimension_numbers = #tpu.dot_dimension_numbers<[1], [0], [0], [1], [0, 0, 1, 1], [], []>} : vector<10x32xbf16>, vector<32x128xbf16>, vector<10x128xf32> -> vector<10x128xf32>
    %c0_12 = arith.constant 0 : index
    %c0_13 = arith.constant 0 : index
    %27 = vector.load %arg5[%c0_12, %c0_13] : memref<1x128xf32, #tpu.memory_space<vmem>>, vector<1x128xf32>
    %28 = vector.broadcast %27 : vector<1x128xf32> to vector<10x128xf32>
    %29 = arith.addf %26, %28 : vector<10x128xf32>
    %cst_14 = arith.constant 0.000000e+00 : f32
    %30 = vector.broadcast %cst_14 : f32 to vector<10x128xf32>
    %31 = arith.maximumf %29, %30 : vector<10x128xf32>
    %32 = arith.truncf %31 : vector<10x128xf32> to vector<10x128xbf16>
    %c0_15 = arith.constant 0 : index
    %c0_16 = arith.constant 0 : index
    %33 = vector.load %arg6[%c0_15, %c0_16] : memref<128x1xbf16, #tpu.memory_space<vmem>>, vector<128x1xbf16>
    %cst_17 = arith.constant dense<0.000000e+00> : vector<10x1xf32>
    %34 = tpu.matmul %32, %33, %cst_17 {dimension_numbers = #tpu.dot_dimension_numbers<[1], [0], [0], [1], [0, 0, 1, 1], [], []>} : vector<10x128xbf16>, vector<128x1xbf16>, vector<10x1xf32> -> vector<10x1xf32>
    %c0_18 = arith.constant 0 : index
    %c0_19 = arith.constant 0 : index
    %35 = vector.load %arg7[%c0_18, %c0_19] : memref<1x1xf32, #tpu.memory_space<vmem>>, vector<1x1xf32>
    %36 = vector.broadcast %35 : vector<1x1xf32> to vector<10x1xf32>
    %37 = arith.addf %34, %36 : vector<10x1xf32>
    %c0_20 = arith.constant 0 : index
    %c0_21 = arith.constant 0 : index
    %38 = vector.load %arg8[%c0_20, %c0_21] : memref<32x1xbf16, #tpu.memory_space<vmem>>, vector<32x1xbf16>
    %cst_22 = arith.constant dense<0.000000e+00> : vector<10x1xf32>
    %39 = tpu.matmul %24, %38, %cst_22 {dimension_numbers = #tpu.dot_dimension_numbers<[1], [0], [0], [1], [0, 0, 1, 1], [], []>} : vector<10x32xbf16>, vector<32x1xbf16>, vector<10x1xf32> -> vector<10x1xf32>
    %c0_23 = arith.constant 0 : index
    %c0_24 = arith.constant 0 : index
    %40 = vector.load %arg9[%c0_23, %c0_24] : memref<1x1xf32, #tpu.memory_space<vmem>>, vector<1x1xf32>
    %41 = vector.broadcast %40 : vector<1x1xf32> to vector<10x1xf32>
    %42 = arith.addf %39, %41 : vector<10x1xf32>
    %43 = arith.negf %42 : vector<10x1xf32>
    %44 = math.exp %43 : vector<10x1xf32>
    %cst_25 = arith.constant 1.000000e+00 : f32
    %45 = vector.broadcast %cst_25 : f32 to vector<10x1xf32>
    %46 = arith.addf %45, %44 : vector<10x1xf32>
    %47 = arith.divf %45, %46 : vector<10x1xf32>
    %48 = tpu.concatenate %37, %47 in 1 : vector<10x1xf32>, vector<10x1xf32> -> vector<10x2xf32>
    %c0_26 = arith.constant 0 : index
    %c0_27 = arith.constant 0 : index
    %49 = vector.load %arg10[%c0_26, %c0_27] : memref<10x2xf32, #tpu.memory_space<vmem>>, vector<10x2xf32>
    tpu.vector_store %arg10[%c0_26, %c0_27], %48 {strides = array<i32>} : memref<10x2xf32, #tpu.memory_space<vmem>>, vector<10x2xf32>,
    return
  }
  func.func @transform_0(%arg0: i32) -> (i32, i32) {
    %c0_i32 = arith.constant 0 : i32
    %c0_i32_0 = arith.constant 0 : i32
    return %arg0, %c0_i32 : i32, i32
  }
  func.func @transform_1(%arg0: i32) -> (i32, i32) {
    %c0_i32 = arith.constant 0 : i32
    %c0_i32_0 = arith.constant 0 : i32
    %c0_i32_1 = arith.constant 0 : i32
    return %c0_i32, %c0_i32_0 : i32, i32
  }
  func.func @transform_2(%arg0: i32) -> (i32, i32) {
    %c0_i32 = arith.constant 0 : i32
    %c0_i32_0 = arith.constant 0 : i32
    %c0_i32_1 = arith.constant 0 : i32
    return %c0_i32, %c0_i32_0 : i32, i32
  }
  func.func @transform_3(%arg0: i32) -> (i32, i32) {
    %c0_i32 = arith.constant 0 : i32
    %c0_i32_0 = arith.constant 0 : i32
    %c0_i32_1 = arith.constant 0 : i32
    return %c0_i32, %c0_i32_0 : i32, i32
  }
  func.func @transform_4(%arg0: i32) -> (i32, i32) {
    %c0_i32 = arith.constant 0 : i32
    %c0_i32_0 = arith.constant 0 : i32
    %c0_i32_1 = arith.constant 0 : i32
    return %c0_i32, %c0_i32_0 : i32, i32
  }
  func.func @transform_5(%arg0: i32) -> (i32, i32) {
    %c0_i32 = arith.constant 0 : i32
    %c0_i32_0 = arith.constant 0 : i32
    %c0_i32_1 = arith.constant 0 : i32
    return %c0_i32, %c0_i32_0 : i32, i32
  }
  func.func @transform_6(%arg0: i32) -> (i32, i32) {
    %c0_i32 = arith.constant 0 : i32
    %c0_i32_0 = arith.constant 0 : i32
    %c0_i32_1 = arith.constant 0 : i32
    return %c0_i32, %c0_i32_0 : i32, i32
  }
  func.func @transform_7(%arg0: i32) -> (i32, i32) {
    %c0_i32 = arith.constant 0 : i32
    %c0_i32_0 = arith.constant 0 : i32
    %c0_i32_1 = arith.constant 0 : i32
    return %c0_i32, %c0_i32_0 : i32, i32
  }
  func.func @transform_8(%arg0: i32) -> (i32, i32) {
    %c0_i32 = arith.constant 0 : i32
    %c0_i32_0 = arith.constant 0 : i32
    %c0_i32_1 = arith.constant 0 : i32
    return %c0_i32, %c0_i32_0 : i32, i32
  }
  func.func @transform_9(%arg0: i32) -> (i32, i32) {
    %c0_i32 = arith.constant 0 : i32
    %c0_i32_0 = arith.constant 0 : i32
    return %arg0, %c0_i32 : i32, i32
  }
}

</mosaic_0001>

<bundles_post_ra>
// kernel: vit_for_age_forward.9
= control target key start
LH: loop header
LB: loop body
LE: loop exit
PB: predicated region body
PF: predicated region fallthrough
CT: control target
= control target key end

     0   :  { %vm25_vm0 = vcmask 261120   ;;  %vm29_vm1 = vcmask 254976   ;;  %v185_v17 = vmov 0.0   ;;  %vm186_vm2 = vmmov 0   ;;  %s247_s0 = inlined_call_operand.vmem [shape: bf16[10,32], index: 0, kind: input, shape index: {}]   ;;  %s248_s3 = inlined_call_operand.vmem [shape: bf16[32,96], index: 3, kind: input, shape index: {}]   ;;  %s249_s1 = inlined_call_operand.vmem [shape: f32[1,32], index: 1, kind: input, shape index: {}]   ;;  %s250_s2 = inlined_call_operand.vmem [shape: f32[1,32], index: 2, kind: input, shape index: {}]   ;;  %s251_s4 = inlined_call_operand.vmem [shape: f32[1,96], index: 4, kind: input, shape index: {}]   ;;  %s252_s5 = inlined_call_operand.vmem [shape: bf16[10,96], index: 5, kind: output, shape index: {}]  }
   0x1   :  { %v21_v0 = vld [vmem:[%s247_s0] sm:$0xf]  ;;  %v22_v1 = vld [vmem:[%s247_s0 + $0x4] sm:$0x1]  ;;  %169 = vmatprep.subr.bf16.mxu0 %v185_v17  ;;  %v180_v18 = vld [vmem:[%s248_s3 + $0x8] sm:$0xff]   ;;  %173 = vmatprep.mubr.msk.bf16.mxu0 %vm186_vm2, %v185_v17  ;;  %vm148_vm3 = vcmask 781312  }
   0x2   :  { %v23_v2 = vunpack.c.l.bf16 %v21_v0  ;;  %v24_v3 = vunpack.c.l.bf16 %v22_v1  ;;  %v179_v16 = vld [vmem:[%s248_s3] sm:$0xff]   ;;  %vm150_vm4 = vcmask 778240  }
   0x3   :  { %170 = vmatpush3.bf16.msra.mxu0 %v179_v16  ;;  %v156_v27 = vld [vmem:[%s249_s1] ss:$0 sm:$0xff] }
   0x4   :  { %v26_v4 = vsel %vm25_vm0, %v23_v2, 0.0  ;;  %v30_v5 = vsel %vm29_vm1, %v24_v3, 0.0  ;;  %171 = vmatprep.subr.bf16.mxu0 %v185_v17  ;;  %v157_v31 = vld [vmem:[%s250_s2] ss:$0 sm:$0xff] }
   0x5   :  { %27 = vadd.xlane.f32.xlu0 %v26_v4  ;;  %v158_v36 = vld [vmem:[%s251_s4] ss:$0 sm:$0xff] }
   0x7   :  { %172 = vmatpush3.bf16.msra.mxu0 %v180_v18 }
   0x9   :  { %31 = vadd.xlane.f32.xlu0 %v30_v5 }
  0x92   :  { %v28_v6 = vpop.xlane.xlu0 %27 }
  0x93   :  { %v34_v7 = vmul.f32 0.03125, %v28_v6 }
  0x95   :  { %v36_v8 = vsub.f32 %v23_v2, %v34_v7 }
  0x96   :  { %v32_v9 = vpop.xlane.xlu0 %31 }
  0x97   :  { %v35_v10 = vmul.f32 0.03125, %v32_v9  ;;  %v38_v11 = vmul.f32 %v36_v8, %v36_v8 }
  0x99   :  { %v37_v12 = vsub.f32 %v24_v3, %v35_v10  ;;  %v40_v13 = vsel %vm25_vm0, %v38_v11, 0.0 }
  0x9a   :  { %41 = vadd.xlane.f32.xlu1 %v40_v13 }
  0x9b   :  { %v39_v14 = vmul.f32 %v37_v12, %v37_v12 }
  0x9d   :  { %v43_v15 = vsel %vm29_vm1, %v39_v14, 0.0 }
  0x9e   :  { %44 = vadd.xlane.f32.xlu1 %v43_v15 }
 0x127   :  { %v42_v19 = vpop.xlane.xlu1 %41 }
 0x128   :  { %v46_v20 = vmul.f32 0.03125, %v42_v19 }
 0x12a   :  { %v48_v21 = vadd.f32 1e-06, %v46_v20 }
 0x12b   :  { %v45_v22 = vpop.xlane.xlu1 %44 }
 0x12c   :  { %181 = vrsqrt.f32 %v48_v21  ;;  %v47_v23 = vmul.f32 0.03125, %v45_v22 }
 0x12e   :  { %v49_v24 = vadd.f32 1e-06, %v47_v23 }
 0x130   :  { %183 = vrsqrt.f32 %v49_v24 }
 0x136   :  { %v182_v25 = vpop.eup %181 }
 0x137   :  { %v52_v26 = vmul.f32 %v182_v25, %v36_v8 }
 0x139   :  { %v61_v30 = vmul.f32 %v156_v27, %v52_v26 }
 0x13a   :  { %v184_v28 = vpop.eup %183 }
 0x13b   :  { %v53_v29 = vmul.f32 %v184_v28, %v37_v12  ;;  %v70_v33 = vadd.f32 %v157_v31, %v61_v30 }
 0x13d   :  { %v62_v32 = vmul.f32 %v156_v27, %v53_v29 }
 0x13f   :  { %v71_v34 = vadd.f32 %v157_v31, %v62_v32 }
 0x141   :  { %v72_v35 = vpack.c.bf16 %v71_v34, %v70_v33 }
 0x143   :  { %174 = vmatmul.mubr.msk.bf16.vlgmr.msra.gmra.mrb[0].mxu0 %vm25_vm0, %v72_v35 }
 0x216   :  { %v133_v37 = vpop.f32.mrb[0].mxu0 }
 0x217   :  { %v134_v38 = vadd.f32 %v158_v36, %v133_v37  ;;  %v175_v39 = vpop.f32.mrb[1].mxu0 }
 0x218   :  { %v136_v40 = vpop.f32.mrb[2].mxu0 }
 0x219   :  { %v164_v41 = vpack.c.bf16 %v134_v38, %v134_v38  ;;  %v137_v42 = vadd.f32 %v158_v36, %v136_v40  ;;  %v176_v43 = vpop.f32.mrb[3].mxu0 }
 0x21b   :  { %149 = vst.msk [vmem:[%s252_s5] sm:$0xf] %vm148_vm3, %v164_v41  ;;  %v165_v44 = vpack.c.bf16 %v137_v42, %v137_v42 }
 0x21d   :  { %151 = vst.msk [vmem:[%s252_s5 + $0x4] sm:$0x1] %vm150_vm4, %v165_v44 }

// kernel: vit_for_age_forward.11
= control target key start
LH: loop header
LB: loop body
LE: loop exit
PB: predicated region body
PF: predicated region fallthrough
CT: control target
= control target key end

     0   :  { %vm31_vm0 = vcmask 261120   ;;  %vm35_vm1 = vcmask 254976   ;;  %v374_v17 = vmov 0.0   ;;  %vm375_vm2 = vmmov 0   ;;  %s483_s0 = inlined_call_operand.vmem [shape: bf16[10,32], index: 0, kind: input, shape index: {}]   ;;  %s484_s3 = inlined_call_operand.vmem [shape: bf16[32,128], index: 3, kind: input, shape index: {}]   ;;  %s485_s1 = inlined_call_operand.vmem [shape: f32[1,32], index: 1, kind: input, shape index: {}]   ;;  %s486_s2 = inlined_call_operand.vmem [shape: f32[1,32], index: 2, kind: input, shape index: {}]   ;;  %s487_s5 = inlined_call_operand.vmem [shape: bf16[128,32], index: 5, kind: input, shape index: {}]   ;;  %s488_s4 = inlined_call_operand.vmem [shape: f32[1,128], index: 4, kind: input, shape index: {}]   ;;  %s489_s6 = inlined_call_operand.vmem [shape: f32[1,32], index: 6, kind: input, shape index: {}]   ;;  %s490_s7 = inlined_call_operand.vmem [shape: bf16[10,32], index: 7, kind: output, shape index: {}]  }
   0x1   :  { %v27_v0 = vld [vmem:[%s483_s0] sm:$0xf]  ;;  %v28_v1 = vld [vmem:[%s483_s0 + $0x4] sm:$0x1]  ;;  %326 = vmatprep.subr.bf16.mxu0 %v374_v17  ;;  %334 = vmatprep.subr.bf16.mxu1 %v374_v17  ;;  %v357_v18 = vld [vmem:[%s484_s3 + $0x8] sm:$0xff]   ;;  %vm287_vm3 = vcmask 257024  }
   0x2   :  { %v422_v2 = vunpack.c.l.bf16 %v27_v0  ;;  %v424_v3 = vunpack.c.l.bf16 %v28_v1  ;;  %v356_v16 = vld [vmem:[%s484_s3] sm:$0xff]   ;;  %330 = vmatprep.mubr.msk.bf16.mxu0 %vm375_vm2, %v374_v17  ;;  %350 = vmatprep.mubr.msk.bf16.mxu1 %vm375_vm2, %v374_v17  ;;  %v359_v37 = vld [vmem:[%s487_s5 + $0x8] sm:$0xff]   ;;  %v360_v38 = vld [vmem:[%s487_s5 + $0x10] sm:$0xff]   ;;  %vm289_vm4 = vcmask 253952  }
   0x3   :  { %327 = vmatpush3.bf16.msra.mxu0 %v356_v16  ;;  %v295_v27 = vld [vmem:[%s485_s1] ss:$0 sm:$0xff]  ;;  %v361_v39 = vld [vmem:[%s487_s5 + $0x18] sm:$0xff]   ;;  %v363_v41 = vld [vmem:[%s487_s5 + $0x28] sm:$0xff]  }
   0x4   :  { %v32_v4 = vsel %vm31_vm0, %v422_v2, 0.0  ;;  %v36_v5 = vsel %vm35_vm1, %v424_v3, 0.0  ;;  %328 = vmatprep.subr.bf16.mxu0 %v374_v17  ;;  %v296_v31 = vld [vmem:[%s486_s2] ss:$0 sm:$0xff]  ;;  %v364_v42 = vld [vmem:[%s487_s5 + $0x30] sm:$0xff]   ;;  %v365_v43 = vld [vmem:[%s487_s5 + $0x38] sm:$0xff]  }
   0x5   :  { %33 = vadd.xlane.f32.xlu0 %v32_v4  ;;  %v358_v36 = vld [vmem:[%s487_s5] sm:$0xff]  }
   0x6   :  { %335 = vmatpush3.bf16.msra.mxu1 %v358_v36  ;;  %v362_v40 = vld [vmem:[%s487_s5 + $0x20] sm:$0xff]  }
   0x7   :  { %329 = vmatpush3.bf16.msra.mxu0 %v357_v18  ;;  %336 = vmatprep.subr.bf16.mxu1 %v374_v17  ;;  %v297_v44 = vld [vmem:[%s488_s4] ss:$0 sm:$0xff] }
   0x9   :  { %37 = vadd.xlane.f32.xlu0 %v36_v5 }
   0xa   :  { %337 = vmatpush3.bf16.msra.mxu1 %v359_v37 }
   0xb   :  { %338 = vmatprep.subr.bf16.mxu1 %v374_v17 }
   0xe   :  { %339 = vmatpush3.bf16.msra.mxu1 %v360_v38 }
   0xf   :  { %340 = vmatprep.subr.bf16.mxu1 %v374_v17 }
  0x12   :  { %341 = vmatpush3.bf16.msra.mxu1 %v361_v39 }
  0x13   :  { %342 = vmatprep.subr.bf16.mxu1 %v374_v17 }
  0x16   :  { %343 = vmatpush3.bf16.msra.mxu1 %v362_v40 }
  0x17   :  { %344 = vmatprep.subr.bf16.mxu1 %v374_v17 }
  0x1a   :  { %345 = vmatpush3.bf16.msra.mxu1 %v363_v41 }
  0x1b   :  { %346 = vmatprep.subr.bf16.mxu1 %v374_v17 }
  0x1e   :  { %347 = vmatpush3.bf16.msra.mxu1 %v364_v42 }
  0x1f   :  { %348 = vmatprep.subr.bf16.mxu1 %v374_v17 }
  0x22   :  { %349 = vmatpush3.bf16.msra.mxu1 %v365_v43 }
  0x92   :  { %v34_v6 = vpop.xlane.xlu0 %33 }
  0x93   :  { %v40_v7 = vmul.f32 0.03125, %v34_v6 }
  0x95   :  { %v42_v8 = vsub.f32 %v422_v2, %v40_v7 }
  0x96   :  { %v38_v9 = vpop.xlane.xlu0 %37 }
  0x97   :  { %v41_v10 = vmul.f32 0.03125, %v38_v9  ;;  %v44_v11 = vmul.f32 %v42_v8, %v42_v8 }
  0x99   :  { %v43_v12 = vsub.f32 %v424_v3, %v41_v10  ;;  %v46_v13 = vsel %vm31_vm0, %v44_v11, 0.0 }
  0x9a   :  { %47 = vadd.xlane.f32.xlu1 %v46_v13 }
  0x9b   :  { %v45_v14 = vmul.f32 %v43_v12, %v43_v12 }
  0x9d   :  { %v49_v15 = vsel %vm35_vm1, %v45_v14, 0.0 }
  0x9e   :  { %50 = vadd.xlane.f32.xlu1 %v49_v15 }
 0x127   :  { %v48_v19 = vpop.xlane.xlu1 %47 }
 0x128   :  { %v52_v20 = vmul.f32 0.03125, %v48_v19 }
 0x12a   :  { %v54_v21 = vadd.f32 1e-06, %v52_v20 }
 0x12b   :  { %v51_v22 = vpop.xlane.xlu1 %50 }
 0x12c   :  { %366 = vrsqrt.f32 %v54_v21  ;;  %v53_v23 = vmul.f32 0.03125, %v51_v22 }
 0x12e   :  { %v55_v24 = vadd.f32 1e-06, %v53_v23 }
 0x130   :  { %368 = vrsqrt.f32 %v55_v24 }
 0x136   :  { %v367_v25 = vpop.eup %366 }
 0x137   :  { %v58_v26 = vmul.f32 %v367_v25, %v42_v8  ;;  %v301_v8 = vld [vmem:[%s489_s6] ss:$0 sm:$0xff] }
 0x139   :  { %v67_v30 = vmul.f32 %v295_v27, %v58_v26 }
 0x13a   :  { %v369_v28 = vpop.eup %368 }
 0x13b   :  { %v59_v29 = vmul.f32 %v369_v28, %v43_v12  ;;  %v76_v33 = vadd.f32 %v296_v31, %v67_v30 }
 0x13d   :  { %v68_v32 = vmul.f32 %v295_v27, %v59_v29 }
 0x13f   :  { %v77_v34 = vadd.f32 %v296_v31, %v68_v32 }
 0x141   :  { %v78_v35 = vpack.c.bf16 %v77_v34, %v76_v33 }
 0x143   :  { %331 = vmatmul.mubr.msk.bf16.vlgmr.msra.gmra.mrb[0].mxu0 %vm31_vm0, %v78_v35 }
 0x216   :  { %v139_v45 = vpop.f32.mrb[0].mxu0 }
 0x217   :  { %v140_v46 = vadd.f32 %v297_v44, %v139_v45  ;;  %v332_v47 = vpop.f32.mrb[1].mxu0 }
 0x218   :  { %v142_v48 = vpop.f32.mrb[2].mxu0 }
 0x219   :  { %v146_v49 = vmul.f32 %v140_v46, %v140_v46  ;;  %v143_v50 = vadd.f32 %v297_v44, %v142_v48  ;;  %v333_v51 = vpop.f32.mrb[3].mxu0 }
 0x21b   :  { %v148_v52 = vmul.f32 %v146_v49, %v140_v46  ;;  %v147_v53 = vmul.f32 %v143_v50, %v143_v50 }
 0x21d   :  { %v150_v54 = vmul.f32 0.044715, %v148_v52  ;;  %v149_v55 = vmul.f32 %v147_v53, %v143_v50 }
 0x21f   :  { %v152_v56 = vadd.f32 %v150_v54, %v140_v46  ;;  %v151_v57 = vmul.f32 0.044715, %v149_v55 }
 0x221   :  { %v154_v58 = vmul.f32 0.7978846, %v152_v56  ;;  %v153_v59 = vadd.f32 %v151_v57, %v143_v50 }
 0x223   :  { %370 = vtanh.f32 %v154_v58  ;;  %v155_v60 = vmul.f32 0.7978846, %v153_v59 }
 0x225   :  { %372 = vtanh.f32 %v155_v60 }
 0x22d   :  { %v371_v61 = vpop.eup %370 }
 0x22e   :  { %v158_v62 = vadd.f32 1.0, %v371_v61 }
 0x22f   :  { %v373_v63 = vpop.eup %372 }
 0x230   :  { %v159_v0 = vadd.f32 1.0, %v373_v63  ;;  %v160_v1 = vmul.f32 0.5, %v158_v62 }
 0x232   :  { %v161_v4 = vmul.f32 0.5, %v159_v0  ;;  %v162_v5 = vmul.f32 %v160_v1, %v140_v46 }
 0x234   :  { %v163_v6 = vmul.f32 %v161_v4, %v143_v50 }
 0x236   :  { %v164_v7 = vpack.c.bf16 %v163_v6, %v162_v5 }
 0x238   :  { %351 = vmatmul.mubr.bf16.vlgmr.msra.gmra.mrb[0].mxu1 %v164_v7 }
 0x30b   :  { %v270_v9 = vpop.f32.mrb[0].mxu1 }
 0x30c   :  { %v271_v10 = vadd.f32 %v301_v8, %v270_v9  ;;  %v352_v11 = vpop.f32.mrb[1].mxu1 }
 0x30d   :  { %v273_v12 = vpop.f32.mrb[2].mxu1 }
 0x30e   :  { %v277_v13 = vadd.f32 %v271_v10, %v422_v2  ;;  %v274_v14 = vadd.f32 %v301_v8, %v273_v12  ;;  %v353_v15 = vpop.f32.mrb[3].mxu1 }
 0x310   :  { %v312_v16 = vpack.c.bf16 %v277_v13, %v277_v13  ;;  %v278_v17 = vadd.f32 %v274_v14, %v424_v3 }
 0x312   :  { %288 = vst.msk [vmem:[%s490_s7] sm:$0xf] %vm287_vm3, %v312_v16  ;;  %v313_v18 = vpack.c.bf16 %v278_v17, %v278_v17 }
 0x314   :  { %290 = vst.msk [vmem:[%s490_s7 + $0x4] sm:$0x1] %vm289_vm4, %v313_v18 }

// kernel: vit_for_age_forward.8
= control target key start
LH: loop header
LB: loop body
LE: loop exit
PB: predicated region body
PF: predicated region fallthrough
CT: control target
= control target key end

     0   :  { %s1062_s18 = smov 0   ;;  %s1251_s0 = inlined_call_operand.vmem [shape: f32[2,4,768], index: 0, kind: input, shape index: {}]   ;;  %s1252_s1 = inlined_call_operand.vmem [shape: bf16[768,32], index: 1, kind: input, shape index: {}]   ;;  %s1253_s2 = inlined_call_operand.vmem [shape: f32[1,32], index: 2, kind: input, shape index: {}]   ;;  %s1254_s3 = inlined_call_operand.vmem [shape: f32[1,32], index: 3, kind: input, shape index: {}]   ;;  %s1255_s4 = inlined_call_operand.vmem [shape: f32[5,32], index: 4, kind: input, shape index: {}]   ;;  %s1256_s5 = inlined_call_operand.vmem [shape: bf16[2,5,32], index: 5, kind: output, shape index: {}]  }
   0x1 LB: > { %s838_s19 = sadd.s32 4294967295, %s1030_s18   ;;  %p842_p0 = scmp.ge.s32.totalorder %s1030_s18, 1  ;;  %s1030_s18 = sphi %s1062_s18, %s15_s18  }
   0x2   : > { %p187_p1 = scmp.lt.s32.totalorder %s1030_s18, 3 }
   0x4   : > { %p188_p2 = pnand %p842_p0, %p187_p1 }
   0x5   : > { %v973_v0 = vld [vmem:[%s1252_s1 + $0x40] sm:$0xff] (!%p188_p2)   ;;  %v977_v4 = vld [vmem:[%s1252_s1 + $0x48] sm:$0xff] (!%p188_p2)   ;;  %v981_v8 = vld [vmem:[%s1252_s1 + $0x50] sm:$0xff] (!%p188_p2)   ;;  %p214_p3 = scmp.lt.s32.totalorder (!%p188_p2), %s838_s19, 1  ;;  %vm757_vm0 = vcmask (!%p188_p2), 253952   ;;  %vm779_vm3 = vcmask (!%p188_p2), 256000  }
   0x6   : > { %191 = sbr.rel (%p188_p2) target bundleno = 299 (0x12b), region = 40  ;;  %v974_v1 = vld [vmem:[%s1252_s1] sm:$0xff] (!%p188_p2)   ;;  %898 = vmatprep.subr.bf16.mxu0 (!%p188_p2), %v973_v0  ;;  %v978_v5 = vld [vmem:[%s1252_s1 + $0x8] sm:$0xff] (!%p188_p2)   ;;  %v982_v9 = vld [vmem:[%s1252_s1 + $0x10] sm:$0xff] (!%p188_p2)   ;;  %vm758_vm1 = vsmask.f32 (!%p188_p2), 256 }
   0x7   : > { %v975_v2 = vld [vmem:[%s1252_s1 + $0xc0] sm:$0xff] (!%p188_p2)   ;;  %899 = vmatpush3.bf16.msra.mxu0 (!%p188_p2), %v974_v1  ;;  %v979_v6 = vld [vmem:[%s1252_s1 + $0xc8] sm:$0xff] (!%p188_p2)   ;;  %v983_v10 = vld [vmem:[%s1252_s1 + $0xd0] sm:$0xff] (!%p188_p2)   ;;  %vm780_vm4 = vsmask.f32 (!%p188_p2), 2306 }
   0x8   : > { %v976_v3 = vld [vmem:[%s1252_s1 + $0x80] sm:$0xff] (!%p188_p2)   ;;  %920 = vmatprep.subr.bf16.mxu1 (!%p188_p2), %v975_v2  ;;  %900 = vmatprep.subr.bf16.mxu0 (!%p188_p2), %v977_v4  ;;  %v980_v7 = vld [vmem:[%s1252_s1 + $0x88] sm:$0xff] (!%p188_p2)   ;;  %v984_v11 = vld [vmem:[%s1252_s1 + $0x90] sm:$0xff] (!%p188_p2)  }
   0x9   : > { %921 = vmatpush3.bf16.msra.mxu1 (!%p188_p2), %v976_v3  ;;  %v985_v12 = vld [vmem:[%s1252_s1 + $0x58] sm:$0xff] (!%p188_p2)   ;;  %v989_v16 = vld [vmem:[%s1252_s1 + $0x60] sm:$0xff] (!%p188_p2)   ;;  %v993_v20 = vld [vmem:[%s1252_s1 + $0x68] sm:$0xff] (!%p188_p2)  }
   0xa   : > { %922 = vmatprep.subr.bf16.mxu1 (!%p188_p2), %v979_v6  ;;  %v986_v13 = vld [vmem:[%s1252_s1 + $0x18] sm:$0xff] (!%p188_p2)   ;;  %v990_v17 = vld [vmem:[%s1252_s1 + $0x20] sm:$0xff] (!%p188_p2)   ;;  %v994_v21 = vld [vmem:[%s1252_s1 + $0x28] sm:$0xff] (!%p188_p2)  }
   0xb   : > { %901 = vmatpush3.bf16.msra.mxu0 (!%p188_p2), %v978_v5  ;;  %v987_v14 = vld [vmem:[%s1252_s1 + $0xd8] sm:$0xff] (!%p188_p2)   ;;  %v991_v18 = vld [vmem:[%s1252_s1 + $0xe0] sm:$0xff] (!%p188_p2)   ;;  %v995_v22 = vld [vmem:[%s1252_s1 + $0xe8] sm:$0xff] (!%p188_p2)  }
   0xc   : > { %902 = vmatprep.subr.bf16.mxu0 (!%p188_p2), %v981_v8  ;;  %v988_v15 = vld [vmem:[%s1252_s1 + $0x98] sm:$0xff] (!%p188_p2)   ;;  %v992_v19 = vld [vmem:[%s1252_s1 + $0xa0] sm:$0xff] (!%p188_p2)   ;;  %v996_v23 = vld [vmem:[%s1252_s1 + $0xa8] sm:$0xff] (!%p188_p2)  }
   0xd   : > { %923 = vmatpush3.bf16.msra.mxu1 %v980_v7  ;;  %s1258_s19 = smov (!%p214_p3, %s838_s19), 1  ;;  %v997_v24 = vld [vmem:[%s1252_s1 + $0x70] sm:$0xff]   ;;  %v1001_v28 = vld [vmem:[%s1252_s1 + $0x78] sm:$0xff]   ;;  %v1006_v35 = vld [vmem:[%s1252_s1 + $0x140] sm:$0xff]  }
   0xe   : > { %924 = vmatprep.subr.bf16.mxu1 %v983_v10  ;;  %s964_s24 = smul.u32 24, %s1258_s19  ;;  %v998_v25 = vld [vmem:[%s1252_s1 + $0x30] sm:$0xff]   ;;  %v1002_v29 = vld [vmem:[%s1252_s1 + $0x38] sm:$0xff]   ;;  %v1008_v39 = vld [vmem:[%s1252_s1 + $0x100] sm:$0xff]   ;;  %s844_s28 = sshll.u32 %s1258_s19, 2 }
   0xf   : > { %903 = vmatpush3.bf16.msra.mxu0 %v982_v9  ;;  %v999_v26 = vld [vmem:[%s1252_s1 + $0xf0] sm:$0xff]   ;;  %v1003_v30 = vld [vmem:[%s1252_s1 + $0xf8] sm:$0xff]   ;;  %v1009_v41 = vld [vmem:[%s1252_s1 + $0x148] sm:$0xff]   ;;  %s1233_s6 = scalar_lea.vmem %s1256_s5, %s844_s28 }
  0x10   : > { %904 = vmatprep.subr.bf16.mxu0 %v985_v12  ;;  %v1000_v27 = vld [vmem:[%s1252_s1 + $0xb0] sm:$0xff]   ;;  %s1167_s10 = scalar_lea.vmem %s1251_s0, %s964_s24  ;;  %v1005_v33 = vld [vmem:[%s1252_s1 + $0xb8] sm:$0xff]   ;;  %v1010_v43 = vld [vmem:[%s1252_s1 + $0x108] sm:$0xff]  }
  0x11   : > { %925 = vmatpush3.bf16.msra.mxu1 %v984_v11  ;;  %v224_v31 = vld [vmem:[%s1167_s10] sm:$0xff]  ;;  %v225_v36 = vld [vmem:[%s1167_s10 + $0x8] sm:$0xff]  ;;  %v1011_v44 = vld [vmem:[%s1252_s1 + $0x150] sm:$0xff]  }
  0x12   : > { %926 = vmatprep.subr.bf16.mxu1 %v987_v14  ;;  %v230_v32 = vcombine.high %v224_v31, %v224_v31  ;;  %v236_v34 = vpack.c.bf16 %v224_v31, %v224_v31  ;;  %v231_v38 = vcombine.high %v225_v36, %v225_v36  ;;  %v238_v40 = vpack.c.bf16 %v225_v36, %v225_v36  ;;  %v1012_v45 = vld [vmem:[%s1252_s1 + $0x110] sm:$0xff]   ;;  %v1013_v46 = vld [vmem:[%s1252_s1 + $0x158] sm:$0xff]   ;;  %v1015_v48 = vld [vmem:[%s1252_s1 + $0x160] sm:$0xff]  }
  0x13   : > { %905 = vmatpush3.bf16.msra.mxu0 %v986_v13  ;;  %v1014_v47 = vld [vmem:[%s1252_s1 + $0x118] sm:$0xff]   ;;  %v226_v49 = vld [vmem:[%s1167_s10 + $0x10] sm:$0xff]  ;;  %v1016_v50 = vld [vmem:[%s1252_s1 + $0x120] sm:$0xff]  }
  0x14   : > { %906 = vmatprep.subr.bf16.mxu0 %v989_v16  ;;  %v237_v37 = vpack.c.bf16 %v230_v32, %v230_v32  ;;  %v239_v42 = vpack.c.bf16 %v231_v38, %v231_v38  ;;  %v232_v51 = vcombine.high %v226_v49, %v226_v49  ;;  %v1017_v52 = vld [vmem:[%s1252_s1 + $0x168] sm:$0xff]   ;;  %v1019_v55 = vld [vmem:[%s1252_s1 + $0x170] sm:$0xff]   ;;  %v1021_v57 = vld [vmem:[%s1252_s1 + $0x178] sm:$0xff]   ;;  %v240_v59 = vpack.c.bf16 %v226_v49, %v226_v49 }
  0x15   : > { %927 = vmatpush3.bf16.msra.mxu1 %v988_v15  ;;  %v1018_v54 = vld [vmem:[%s1252_s1 + $0x128] sm:$0xff]   ;;  %v1020_v56 = vld [vmem:[%s1252_s1 + $0x130] sm:$0xff]   ;;  %v1022_v58 = vld [vmem:[%s1252_s1 + $0x138] sm:$0xff]  }
  0x16   : > { %928 = vmatprep.subr.bf16.mxu1 %v991_v18  ;;  %665 = vmatprep.mubr.bf16.mxu0 %v237_v37  ;;  %v241_v53 = vpack.c.bf16 %v232_v51, %v232_v51  ;;  %v753_v60 = vld [vmem:[%s1255_s4] sm:$0x1f]  ;;  %vm759_vm2 = vmand %vm757_vm0, %vm758_vm1 }
  0x17   : > { %907 = vmatpush3.bf16.msra.mxu0 %v990_v17  ;;  %705 = vmatprep.mubr.bf16.mxu1 %v239_v42  ;;  %v754_v61 = vld [vmem:[%s1254_s3] sm:$0x1]  ;;  %v764_v18 = vrot.slane %v753_v60, 1  ;;  %vm781_vm5 = vmand %vm779_vm3, %vm780_vm4 }
  0x18   : > { %908 = vmatprep.subr.bf16.mxu0 %v993_v20  ;;  %v755_v62 = vadd.f32 %v754_v61, %v753_v60  ;;  %v760_v63 = vld [vmem:[%s1233_s6] sm:$0x1] }
  0x19   : > { %929 = vmatpush3.bf16.msra.mxu1 %v992_v19  ;;  %v845_v3 = vld [vmem:[%s1253_s2] ss:$0 sm:$0xff] }
  0x1a   : > { %930 = vmatprep.subr.bf16.mxu1 %v995_v22  ;;  %v756_v0 = vpack.c.bf16 %v755_v62, %v755_v62 }
  0x1b   : > { %909 = vmatpush3.bf16.msra.mxu0 %v994_v21 }
  0x1c   : > { %910 = vmatprep.subr.bf16.mxu0 %v997_v24  ;;  %v761_v1 = vsel %vm759_vm2, %v756_v0, %v760_v63 }
  0x1d   : > { %931 = vmatpush3.bf16.msra.mxu1 %v996_v23  ;;  %762 = vst [vmem:[%s1233_s6] sm:$0x1] %v761_v1 }
  0x1e   : > { %932 = vmatprep.subr.bf16.mxu1 %v999_v26 }
  0x1f   : > { %911 = vmatpush3.bf16.msra.mxu0 %v998_v25 }
  0x20   : > { %912 = vmatprep.subr.bf16.mxu0 %v1001_v28 }
  0x21   : > { %933 = vmatpush3.bf16.msra.mxu1 %v1000_v27 }
  0x22   : > { %934 = vmatprep.subr.bf16.mxu1 %v1003_v30 }
  0x23   : > { %913 = vmatpush3.bf16.msra.mxu0 %v1002_v29 }
  0x24   : > { %942 = vmatprep.subr.bf16.mxu0 %v1006_v35  ;;  %v782_v27 = vld [vmem:[%s1233_s6] sm:$0x7] }
  0x25   : > { %935 = vmatpush3.bf16.msra.mxu1 %v1005_v33 }
  0x26   : > { %666 = vmatmul.mubr.bf16.vlgmr.msra.gmra.mrb[0].mxu0 %v236_v34 }
  0x27   : > { %943 = vmatpush3.bf16.msra.mxu0 %v1008_v39  ;;  %745 = vmatprep.mubr.bf16.mxu0 %v241_v53 }
  0x28   : > { %706 = vmatmul.mubr.bf16.vlgmr.msra.gmra.mrb[0].mxu1 %v238_v40  ;;  %944 = vmatprep.subr.bf16.mxu0 %v1009_v41 }
  0x2b   : > { %945 = vmatpush3.bf16.msra.mxu0 %v1010_v43 }
  0x2c   : > { %946 = vmatprep.subr.bf16.mxu0 %v1011_v44 }
  0x2f   : > { %947 = vmatpush3.bf16.msra.mxu0 %v1012_v45 }
  0x30   : > { %948 = vmatprep.subr.bf16.mxu0 %v1013_v46 }
  0x33   : > { %949 = vmatpush3.bf16.msra.mxu0 %v1014_v47 }
  0x34   : > { %950 = vmatprep.subr.bf16.mxu0 %v1015_v48 }
  0x37   : > { %951 = vmatpush3.bf16.msra.mxu0 %v1016_v50 }
  0x38   : > { %952 = vmatprep.subr.bf16.mxu0 %v1017_v52 }
  0x3b   : > { %953 = vmatpush3.bf16.msra.mxu0 %v1018_v54 }
  0x3c   : > { %954 = vmatprep.subr.bf16.mxu0 %v1019_v55 }
  0x3f   : > { %955 = vmatpush3.bf16.msra.mxu0 %v1020_v56 }
  0x40   : > { %956 = vmatprep.subr.bf16.mxu0 %v1021_v57 }
  0x43   : > { %957 = vmatpush3.bf16.msra.mxu0 %v1022_v58 }
  0x46   : > { %746 = vmatmul.mubr.bf16.vlgmr.msra.gmra.mrb[4].mxu0 %v240_v59 }
  0xf9   : > { %v914_v2 = vpop.f32.mrb[0].mxu0 }
  0xfa   : > { %v915_v4 = vpop.f32.mrb[1].mxu0 }
  0xfb   : > { %v916_v5 = vadd.f32 %v915_v4, %v914_v2  ;;  %v917_v6 = vpop.f32.mrb[2].mxu0  ;;  %v936_v7 = vpop.f32.mrb[0].mxu1 }
  0xfc   : > { %v918_v8 = vpop.f32.mrb[3].mxu0  ;;  %v937_v9 = vpop.f32.mrb[1].mxu1 }
  0xfd   : > { %v668_v10 = vadd.f32 %v916_v5, %v845_v3  ;;  %v938_v11 = vadd.f32 %v937_v9, %v936_v7  ;;  %v939_v12 = vpop.f32.mrb[2].mxu1 }
  0xfe   : > { %v940_v13 = vpop.f32.mrb[3].mxu1 }
  0xff   : > { %v708_v14 = vadd.f32 %v938_v11, %v668_v10 }
 0x119   : > { %v958_v15 = vpop.f32.mrb[4].mxu0 }
 0x11a   : > { %v959_v16 = vpop.f32.mrb[5].mxu0 }
 0x11b   : > { %v960_v17 = vadd.f32 %v959_v16, %v958_v15  ;;  %v961_v19 = vpop.f32.mrb[6].mxu0 }
 0x11c   : > { %v962_v20 = vpop.f32.mrb[7].mxu0 }
 0x11d   : > { %v748_v21 = vadd.f32 %v960_v17, %v708_v14 }
 0x11f   : > { %v766_v22 = vadd.f32 %v764_v18, %v748_v21 }
 0x121   : > { %v897_v23 = vpack.c.bf16 %v766_v22, %v766_v22 }
 0x123   : > { %v772_v24 = vshrl.u32 %v897_v23, 16  ;;  %v775_v26 = vshll.u32 %v897_v23, 16 }
 0x125   : > { %v774_v25 = vrot.slane %v772_v24, 7 }
 0x127   : > { %v777_v28 = vor.u32 %v775_v26, %v774_v25 }
 0x129   : > { %v783_v29 = vsel %vm781_vm5, %v777_v28, %v782_v27 }
 0x12a   : > { %784 = vst [vmem:[%s1233_s6] sm:$0x7] %v783_v29 }
 0x12b PF: > { %s15_s18 = sadd.s32 1, %s1030_s18  }
 0x12c   : > { %p12_p4 = scmp.ge.s32.totalorder %s15_s18, 4  }
 0x12e   :  { %14 = sbr.rel (!%p12_p4) target bundleno = 1 (0x1), region = 70 }

// kernel: vit_for_age_forward.10
= control target key start
LH: loop header
LB: loop body
LE: loop exit
PB: predicated region body
PF: predicated region fallthrough
CT: control target
= control target key end

     0   :  { %s1160_s15 = smov 0   ;;  %s1291_s0 = inlined_call_operand.vmem [shape: bf16[2,5,96], index: 0, kind: input, shape index: {}]   ;;  %s1292_s1 = inlined_call_operand.vmem [shape: bf16[32,32], index: 1, kind: input, shape index: {}]   ;;  %s1293_s2 = inlined_call_operand.vmem [shape: f32[1,32], index: 2, kind: input, shape index: {}]   ;;  %s1294_s3 = inlined_call_operand.vmem [shape: bf16[2,5,32], index: 3, kind: input, shape index: {}]   ;;  %s1295_s4 = inlined_call_operand.vmem [shape: bf16[2,5,32], index: 4, kind: output, shape index: {}]  }
   0x1 LB: > { %s954_s16 = sadd.s32 4294967295, %s1119_s15   ;;  %p958_p0 = scmp.ge.s32.totalorder %s1119_s15, 1  ;;  %s1119_s15 = sphi %s1160_s15, %s14_s15  }
   0x2   : > { %p170_p1 = scmp.lt.s32.totalorder %s1119_s15, 3 }
   0x4   : > { %p171_p2 = pnand %p958_p0, %p170_p1 }
   0x5   : > { %p198_p3 = scmp.lt.s32.totalorder (!%p171_p2), %s954_s16, 1  ;;  %v1121_v0 = vmov (!%p171_p2), 0.0   ;;  %vm1122_vm0 = vmmov (!%p171_p2), 0   ;;  %s1123_s21 = smov (!%p171_p2), 96   ;;  %vm232_vm1 = vcmask (!%p171_p2), 64512   ;;  %vm279_vm2 = vcmask (!%p171_p2), 36864  }
   0x6   : > { %174 = sbr.rel (%p171_p2) target bundleno = 1941 (0x795), region = 36  ;;  %1002 = vmatprep.subr.bf16.mxu0 (!%p171_p2), %v1121_v0  ;;  %1004 = vmatprep.mubr.msk.bf16.mxu0 (!%p171_p2), %vm1122_vm0, %v1121_v0  ;;  %s1124_s22 = smov (!%p171_p2), 88   ;;  %vm297_vm3 = vcmask (!%p171_p2), 1041408   ;;  %vm298_vm4 = vcmask (!%p171_p2), 1042432   ;;  %v1127_v22 = vmov (!%p171_p2), 65535   ;;  %vm293_vm5 = vcmask (!%p171_p2), 39936  }
   0x7   : > { %1008 = vmatprep.subr.bf16.mxu1 (!%p171_p2), %v1121_v0  ;;  %1010 = vmatprep.mubr.msk.bf16.mxu1 (!%p171_p2), %vm1122_vm0, %v1121_v0  ;;  %s1125_s23 = smov (!%p171_p2), 120   ;;  %s1126_s24 = smov (!%p171_p2), 64   ;;  %v299_v23 = vsel (!%p171_p2), %vm297_vm3, 4294967295, %v1127_v22  ;;  %v347_v32 = vld [vmem:[%s1292_s1] sm:$0xf] (!%p171_p2)  ;;  %vm351_vm6 = vcmask (!%p171_p2), 1043456  }
   0x8   : > { %v1201_v24 = vsel (!%p171_p2), %vm298_vm4, %v299_v23, 0  ;;  %s1128_s25 = smov (!%p171_p2), 80   ;;  %s1129_s26 = smov (!%p171_p2), 112   ;;  %v353_v33 = vsel (!%p171_p2), %vm351_vm6, %v347_v32, 0  ;;  %v962_v40 = vld [vmem:[%s1293_s2] ss:$0 sm:$0xff] (!%p171_p2) }
   0x9   : > { %s1130_s29 = smov (!%p171_p2), 56   ;;  %vm222_vm7 = vcmask (!%p171_p2), 258048   ;;  %v510_v57 = vld [vmem:[%s1292_s1 + $0x4] sm:$0xf] (!%p171_p2)  ;;  %s1131_s11 = smov (!%p171_p2), 48   ;;  %vm883_vm8 = vcmask (!%p171_p2), 256000  }
   0xa   : > { %v515_v58 = vsel (!%p171_p2), %vm351_vm6, %v510_v57, 0  ;;  %s1132_s12 = smov (!%p171_p2), 104   ;;  %s1133_s13 = smov (!%p171_p2), 72   ;;  %vm884_vm9 = vsmask.f32 (!%p171_p2), 2304 }
   0xb   : > { %s1134_s18 = smov (!%p171_p2), 40   ;;  %vm885_vm10 = vmand (!%p171_p2), %vm883_vm8, %vm884_vm9 }
   0xd   : > { %s1297_s16 = smov (!%p198_p3, %s954_s16), 1 }
   0xe   : > { %s1174_s17 = sshll.u32 %s1297_s16, 2 }
   0xf   : > { %s201_s20 = scalar_lea.vmem %s1291_s0, %s1174_s17  ;;  %s205_s6 = scalar_lea.vmem %s1294_s3, %s1174_s17 }
  0x10   : > { %v211_v1 = vld [vmem:[%s201_s20] sm:$0x7] }
  0x11   : > { %v1180_v2 = vcombine.low %v211_v1, %v211_v1  ;;  %v224_v3 = vunpack.c.l.bf16 %v211_v1  ;;  %v212_v39 = vld [vmem:[%s205_s6] sm:$0x7] }
  0x12   : > { %v213_v41 = vunpack.c.l.bf16 %v212_v39 }
  0x13   : > { %230 = vrot.lane.b32.xlu0 %v1180_v2, %s1123_s21  ;;  %v225_v4 = vmul.f32 0.35355338, %v224_v3 }
  0x14   : > { %v221_v42 = vadd.f32 %v962_v40, %v213_v41 }
  0x15   : > { %v1183_v5 = vpack.c.bf16 %v225_v4, %v225_v4 }
  0x16   : > { %223 = vst.msk [vmem:[#allocation2] sm:$0x1f] %vm222_vm7, %v221_v42 }
  0x17   : > { %400 = vrot.lane.b32.xlu0 %v1180_v2, %s1124_s22  ;;  %398 = vrot.lane.b32.xlu1 %v1183_v5, %s1125_s23  ;;  %s209_s23 = scalar_lea.vmem %s1295_s4, %s1174_s17 }
  0x1b   : > { %291 = vrot.lane.b32.xlu0 %v1180_v2, %s1126_s24 }
  0x1d   : > { %v345_v60 = vld [vmem:[#allocation2] sm:$0x1f] }
  0x85   : > { %v231_v6 = vpop.permute.xlu0 %230 }
  0x86   : > { %v237_v7 = vsel %vm232_vm1, %v231_v6, 0 }
  0x87   : > { %1003 = vmatpush3.bf16.xpose.msra.mxu0 %v237_v7 }
  0x88   : > { %1020 = vmatprep.subr.bf16.mxu0 %v1121_v0 }
  0x89   : > { %v401_v8 = vpop.permute.xlu0 %400  ;;  %v399_v10 = vpop.permute.xlu1 %398 }
  0x8a   : > { %v406_v9 = vsel %vm232_vm1, %v401_v8, 0 }
  0x8d   : > { %v292_v21 = vpop.permute.xlu0 %291 }
  0x8e   : > { %1005 = vmatmul.mubr.msk.bf16.vlgmr.msra.gmra.mrb[0].mxu0 %vm232_vm1, %v1183_v5  ;;  %v302_v25 = vand.u32 %v1201_v24, %v292_v21 }
  0x8f   : > { %1021 = vmatpush3.bf16.xpose.msra.mxu0 %v406_v9  ;;  %1022 = vmatprep.mubr.msk.bf16.mxu0 %vm1122_vm0, %v1121_v0 }
  0x90   : > { %1032 = vmatprep.subr.bf16.mxu0 %v1121_v0  ;;  %1009 = vmatpush3.bf16.msra.mxu1 %v302_v25 }
  0x91   : > { %1014 = vmatprep.subr.bf16.mxu1 %v1121_v0 }
  0x96   : > { %1023 = vmatmul.mubr.msk.bf16.vlgmr.msra.gmra.mrb[4].mxu0 %vm232_vm1, %v399_v10 }
  0x97   : > { %1034 = vmatprep.mubr.msk.bf16.mxu0 %vm1122_vm0, %v1121_v0  ;;  %1033 = vmatpush3.bf16.msra.mxu0 %v515_v58 }
  0x98   : > { %1044 = vmatprep.subr.bf16.mxu0 %v1121_v0 }
 0x161   : > { %v273_v11 = vpop.f32.mrb[0].mxu0 }
 0x162   : > { %v1006_v12 = vpop.f32.mrb[1].mxu0  ;;  %v280_v13 = vsel %vm279_vm2, %v273_v11, -inf }
 0x163   : > { %281 = vmax.xlane.f32.xlu1 %v280_v13  ;;  %v276_v14 = vpop.f32.mrb[2].mxu0 }
 0x164   : > { %v1007_v15 = vpop.f32.mrb[3].mxu0 }
 0x169   : > { %v442_v16 = vpop.f32.mrb[4].mxu0 }
 0x16a   : > { %v448_v17 = vsel %vm279_vm2, %v442_v16, -inf  ;;  %v1024_v18 = vpop.f32.mrb[5].mxu0 }
 0x16b   : > { %449 = vmax.xlane.f32.xlu1 %v448_v17  ;;  %v445_v19 = vpop.f32.mrb[6].mxu0 }
 0x16c   : > { %v1025_v20 = vpop.f32.mrb[7].mxu0 }
 0x17c   : > { %561 = vrot.lane.b32.xlu1 %v1180_v2, %s1128_s25 }
 0x180   : > { %559 = vrot.lane.b32.xlu1 %v1183_v5, %s1129_s26 }
 0x1f0   : > { %v282_v26 = vpop.xlane.xlu1 %281 }
 0x1f1   : > { %v283_v27 = vsub.f32 %v273_v11, %v282_v26 }
 0x1f3   : > { %v284_v28 = vmul.f32 1.442695, %v283_v27 }
 0x1f5   : > { %1097 = vpow2.f32 %v284_v28 }
 0x1f8   : > { %v450_v34 = vpop.xlane.xlu1 %449 }
 0x1f9   : > { %v451_v35 = vsub.f32 %v442_v16, %v450_v34  ;;  %v671_v34 = vld [vmem:[%s1292_s1 + $0x8] sm:$0xf] }
 0x1fb   : > { %v452_v36 = vmul.f32 1.442695, %v451_v35  ;;  %v676_v35 = vsel %vm351_vm6, %v671_v34, 0 }
 0x1fc   : > { %v562_v53 = vpop.permute.xlu1 %561 }
 0x1fd   : > { %1099 = vpow2.f32 %v452_v36  ;;  %v567_v55 = vsel %vm232_vm1, %v562_v53, 0 }
 0x1ff   : > { %v1098_v29 = vpop.eup %1097 }
 0x200   : > { %v286_v30 = vsel %vm279_vm2, %v1098_v29, 0.0  ;;  %v290_v31 = vpack.c.bf16 %v1098_v29, %v1098_v29  ;;  %v560_v56 = vpop.permute.xlu1 %559 }
 0x201   : > { %287 = vadd.xlane.f32.xlu0 %v286_v30 }
 0x202   : > { %1011 = vmatmul.mubr.msk.bf16.vlgmr.msra.gmra.mrb[0].mxu1 %vm293_vm5, %v290_v31 }
 0x203   : > { %1016 = vmatprep.mubr.msk.bf16.mxu1 %vm1122_vm0, %v1121_v0  ;;  %1015 = vmatpush3.bf16.msra.mxu1 %v353_v33 }
 0x204   : > { %1026 = vmatprep.subr.bf16.mxu1 %v1121_v0 }
 0x207   : > { %v1100_v37 = vpop.eup %1099 }
 0x208   : > { %v454_v38 = vsel %vm279_vm2, %v1100_v37, 0.0  ;;  %v458_v54 = vpack.c.bf16 %v1100_v37, %v1100_v37 }
 0x217   : > { %459 = vrot.lane.b32.xlu0 %v1180_v2, %s1130_s29 }
 0x236   : > { %455 = vadd.xlane.f32.xlu0 %v454_v38 }
 0x24c   : > { %620 = vrot.lane.b32.xlu0 %v1180_v2, %s1131_s11 }
 0x250   : > { %720 = vrot.lane.b32.xlu0 %v1183_v5, %s1132_s12 }
 0x28e   : > { %v288_v43 = vpop.xlane.xlu0 %287 }
 0x28f   : > { %1101 = vrcp.f32 %v288_v43 }
 0x292   : > { %v460_v44 = vpop.permute.xlu0 %459 }
 0x293   : > { %v465_v50 = vand.u32 %v460_v44, %v1201_v24 }
 0x299   : > { %v1102_v45 = vpop.eup %1101 }
 0x2c3   : > { %v456_v59 = vpop.xlane.xlu0 %455 }
 0x2c4   : > { %1103 = vrcp.f32 %v456_v59 }
 0x2c7   : > { %v621_v16 = vpop.permute.xlu0 %620 }
 0x2c8   : > { %v626_v17 = vand.u32 %v621_v16, %v1201_v24 }
 0x2cb   : > { %v721_v27 = vpop.permute.xlu0 %720 }
 0x2ce   : > { %v1104_v4 = vpop.eup %1103 }
 0x2d5   : > { %v338_v46 = vpop.f32.mrb[0].mxu1 }
 0x2d6   : > { %v344_v47 = vmul.f32 %v1102_v45, %v338_v46  ;;  %v1012_v48 = vpop.f32.mrb[1].mxu1 }
 0x2d7   : > { %v341_v49 = vpop.f32.mrb[2].mxu1 }
 0x2d8   : > { %v346_v51 = vpack.c.bf16 %v344_v47, %v344_v47  ;;  %v1013_v52 = vpop.f32.mrb[3].mxu1 }
 0x2da   : > { %1017 = vmatmul.mubr.msk.bf16.vlgmr.msra.gmra.mrb[4].mxu1 %vm232_vm1, %v346_v51 }
 0x2db   : > { %1027 = vmatpush3.bf16.msra.mxu1 %v465_v50  ;;  %1028 = vmatprep.mubr.msk.bf16.mxu1 %vm1122_vm0, %v1121_v0 }
 0x2dc   : > { %1038 = vmatprep.subr.bf16.mxu1 %v1121_v0 }
 0x2e2   : > { %1029 = vmatmul.mubr.msk.bf16.vlgmr.msra.gmra.mrb[8].mxu1 %vm293_vm5, %v458_v54 }
 0x2e3   : > { %1040 = vmatprep.mubr.msk.bf16.mxu1 %vm1122_vm0, %v1121_v0 }
 0x2e4   : > { %1039 = vmatpush3.bf16.xpose.msra.mxu1 %v567_v55 }
 0x2e5   : > { %1050 = vmatprep.subr.bf16.mxu1 %v1121_v0 }
 0x2eb   : > { %1041 = vmatmul.mubr.msk.bf16.vlgmr.msra.gmra.mrb[12].mxu1 %vm232_vm1, %v560_v56  ;;  %v832_v56 = vld [vmem:[%s1292_s1 + $0xc] sm:$0xf] }
 0x2ec   : > { %1052 = vmatprep.mubr.msk.bf16.mxu1 %vm1122_vm0, %v1121_v0  ;;  %1051 = vmatpush3.bf16.msra.mxu1 %v676_v35 }
 0x2ed   : > { %1062 = vmatprep.subr.bf16.mxu1 %v1121_v0 }
 0x3ad   : > { %v389_v61 = vpop.f32.mrb[4].mxu1 }
 0x3ae   : > { %v395_v62 = vadd.f32 %v389_v61, %v345_v60  ;;  %v1018_v63 = vpop.f32.mrb[5].mxu1 }
 0x3af   : > { %v392_v1 = vpop.f32.mrb[6].mxu1 }
 0x3b0   : > { %396 = vst.msk [vmem:[#allocation2] sm:$0x1f] %vm222_vm7, %v395_v62  ;;  %v1019_v3 = vpop.f32.mrb[7].mxu1 }
 0x3b5   : > { %v501_v6 = vpop.f32.mrb[8].mxu1 }
 0x3b6   : > { %v507_v7 = vmul.f32 %v1104_v4, %v501_v6  ;;  %v1030_v8 = vpop.f32.mrb[9].mxu1 }
 0x3b7   : > { %v504_v9 = vpop.f32.mrb[10].mxu1  ;;  %v508_v28 = vld [vmem:[#allocation2] sm:$0x1f] }
 0x3b8   : > { %v509_v10 = vpack.c.bf16 %v507_v7, %v507_v7  ;;  %v1031_v11 = vpop.f32.mrb[11].mxu1 }
 0x3ba   : > { %1035 = vmatmul.mubr.msk.bf16.vlgmr.msra.gmra.mrb[8].mxu0 %vm232_vm1, %v509_v10 }
 0x3bb   : > { %1046 = vmatprep.mubr.msk.bf16.mxu0 %vm1122_vm0, %v1121_v0  ;;  %1045 = vmatpush3.bf16.msra.mxu0 %v626_v17 }
 0x3bc   : > { %1056 = vmatprep.subr.bf16.mxu0 %v1121_v0 }
 0x3be   : > { %v603_v5 = vpop.f32.mrb[12].mxu1 }
 0x3bf   : > { %v1042_v12 = vpop.f32.mrb[13].mxu1  ;;  %v609_v13 = vsel %vm279_vm2, %v603_v5, -inf }
 0x3c0   : > { %610 = vmax.xlane.f32.xlu1 %v609_v13  ;;  %v606_v14 = vpop.f32.mrb[14].mxu1 }
 0x3c1   : > { %v1043_v15 = vpop.f32.mrb[15].mxu1  ;;  %v886_v14 = vld [vmem:[%s209_s23] sm:$0x7] }
 0x3d1   : > { %722 = vrot.lane.b32.xlu1 %v1180_v2, %s1133_s13 }
 0x44d   : > { %v611_v18 = vpop.xlane.xlu1 %610 }
 0x44e   : > { %v612_v19 = vsub.f32 %v603_v5, %v611_v18 }
 0x450   : > { %v613_v20 = vmul.f32 1.442695, %v612_v19 }
 0x451   : > { %v723_v21 = vpop.permute.xlu1 %722 }
 0x452   : > { %1105 = vpow2.f32 %v613_v20  ;;  %v728_v25 = vsel %vm232_vm1, %v723_v21, 0 }
 0x45c   : > { %v1106_v22 = vpop.eup %1105 }
 0x45d   : > { %v615_v23 = vsel %vm279_vm2, %v1106_v22, 0.0  ;;  %v619_v26 = vpack.c.bf16 %v1106_v22, %v1106_v22 }
 0x45e   : > { %616 = vadd.xlane.f32.xlu1 %v615_v23 }
 0x45f   : > { %1047 = vmatmul.mubr.msk.bf16.vlgmr.msra.gmra.mrb[12].mxu0 %vm293_vm5, %v619_v26 }
 0x460   : > { %1057 = vmatpush3.bf16.xpose.msra.mxu0 %v728_v25  ;;  %1058 = vmatprep.mubr.msk.bf16.mxu0 %vm1122_vm0, %v1121_v0 }
 0x461   : > { %1068 = vmatprep.subr.bf16.mxu0 %v1121_v0 }
 0x467   : > { %1059 = vmatmul.mubr.msk.bf16.vlgmr.msra.gmra.mrb[16].mxu0 %vm232_vm1, %v721_v27 }
 0x468   : > { %1070 = vmatprep.mubr.msk.bf16.mxu0 %vm1122_vm0, %v1121_v0 }
 0x48d   : > { %v551_v29 = vpop.f32.mrb[8].mxu0 }
 0x48e   : > { %v557_v30 = vadd.f32 %v551_v29, %v508_v28  ;;  %v1036_v31 = vpop.f32.mrb[9].mxu0 }
 0x48f   : > { %v554_v32 = vpop.f32.mrb[10].mxu0 }
 0x490   : > { %558 = vst.msk [vmem:[#allocation2] sm:$0x1f] %vm222_vm7, %v557_v30  ;;  %v1037_v33 = vpop.f32.mrb[11].mxu0 }
 0x497   : > { %v669_v57 = vld [vmem:[#allocation2] sm:$0x1f] }
 0x4eb   : > { %v617_v36 = vpop.xlane.xlu1 %616 }
 0x4ec   : > { %1107 = vrcp.f32 %v617_v36 }
 0x4f6   : > { %v1108_v37 = vpop.eup %1107 }
 0x532   : > { %v662_v38 = vpop.f32.mrb[12].mxu0 }
 0x533   : > { %v668_v39 = vmul.f32 %v1108_v37, %v662_v38  ;;  %v1048_v40 = vpop.f32.mrb[13].mxu0 }
 0x534   : > { %v665_v41 = vpop.f32.mrb[14].mxu0 }
 0x535   : > { %v670_v42 = vpack.c.bf16 %v668_v39, %v668_v39  ;;  %v1049_v43 = vpop.f32.mrb[15].mxu0 }
 0x537   : > { %1053 = vmatmul.mubr.msk.bf16.vlgmr.msra.gmra.mrb[16].mxu1 %vm232_vm1, %v670_v42 }
 0x538   : > { %1064 = vmatprep.mubr.msk.bf16.mxu1 %vm1122_vm0, %v1121_v0 }
 0x53a   : > { %v764_v44 = vpop.f32.mrb[16].mxu0 }
 0x53b   : > { %v1060_v45 = vpop.f32.mrb[17].mxu0  ;;  %v770_v46 = vsel %vm279_vm2, %v764_v44, -inf }
 0x53c   : > { %771 = vmax.xlane.f32.xlu0 %v770_v46  ;;  %v767_v47 = vpop.f32.mrb[18].mxu0 }
 0x53d   : > { %v1061_v48 = vpop.f32.mrb[19].mxu0 }
 0x552   : > { %781 = vrot.lane.b32.xlu0 %v1180_v2, %s1134_s18  ;;  %v837_v2 = vsel %vm351_vm6, %v832_v56, 0 }
 0x553   : > { %1069 = vmatpush3.bf16.msra.mxu0 %v837_v2 }
 0x5c9   : > { %v772_v49 = vpop.xlane.xlu0 %771 }
 0x5ca   : > { %v773_v50 = vsub.f32 %v764_v44, %v772_v49 }
 0x5cc   : > { %v774_v51 = vmul.f32 1.442695, %v773_v50 }
 0x5cd   : > { %v782_v52 = vpop.permute.xlu0 %781 }
 0x5ce   : > { %1109 = vpow2.f32 %v774_v51  ;;  %v787_v53 = vand.u32 %v782_v52, %v1201_v24 }
 0x5d0   : > { %1063 = vmatpush3.bf16.msra.mxu1 %v787_v53 }
 0x5d8   : > { %v1110_v54 = vpop.eup %1109 }
 0x5d9   : > { %v776_v0 = vsel %vm279_vm2, %v1110_v54, 0.0  ;;  %v780_v55 = vpack.c.bf16 %v1110_v54, %v1110_v54 }
 0x5da   : > { %777 = vadd.xlane.f32.xlu1 %v776_v0 }
 0x5db   : > { %1065 = vmatmul.mubr.msk.bf16.vlgmr.msra.gmra.mrb[20].mxu1 %vm293_vm5, %v780_v55 }
 0x60a   : > { %v712_v58 = vpop.f32.mrb[16].mxu1 }
 0x60b   : > { %v718_v59 = vadd.f32 %v712_v58, %v669_v57  ;;  %v1054_v60 = vpop.f32.mrb[17].mxu1 }
 0x60c   : > { %v715_v24 = vpop.f32.mrb[18].mxu1 }
 0x60d   : > { %719 = vst.msk [vmem:[#allocation2] sm:$0x1f] %vm222_vm7, %v718_v59  ;;  %v1055_v61 = vpop.f32.mrb[19].mxu1 }
 0x614   : > { %v830_v9 = vld [vmem:[#allocation2] sm:$0x1f] }
 0x667   : > { %v778_v62 = vpop.xlane.xlu1 %777 }
 0x668   : > { %1111 = vrcp.f32 %v778_v62 }
 0x672   : > { %v1112_v63 = vpop.eup %1111 }
 0x6ae   : > { %v823_v1 = vpop.f32.mrb[20].mxu1 }
 0x6af   : > { %v829_v3 = vmul.f32 %v1112_v63, %v823_v1  ;;  %v1066_v4 = vpop.f32.mrb[21].mxu1 }
 0x6b0   : > { %v826_v6 = vpop.f32.mrb[22].mxu1 }
 0x6b1   : > { %v831_v7 = vpack.c.bf16 %v829_v3, %v829_v3  ;;  %v1067_v8 = vpop.f32.mrb[23].mxu1 }
 0x6b3   : > { %1071 = vmatmul.mubr.msk.bf16.vlgmr.msra.gmra.mrb[20].mxu0 %vm232_vm1, %v831_v7 }
 0x786   : > { %v873_v10 = vpop.f32.mrb[20].mxu0 }
 0x787   : > { %v879_v11 = vadd.f32 %v873_v10, %v830_v9  ;;  %v1072_v5 = vpop.f32.mrb[21].mxu0 }
 0x788   : > { %v876_v12 = vpop.f32.mrb[22].mxu0 }
 0x789   : > { %880 = vst.msk [vmem:[#allocation2] sm:$0x1f] %vm222_vm7, %v879_v11  ;;  %v1073_v13 = vpop.f32.mrb[23].mxu0 }
 0x790   : > { %v881_v15 = vld [vmem:[#allocation2] sm:$0x1f] }
 0x791   : > { %v882_v16 = vpack.c.bf16 %v881_v15, %v881_v15 }
 0x793   : > { %v887_v17 = vsel %vm885_vm10, %v882_v16, %v886_v14 }
 0x794   : > { %888 = vst [vmem:[%s209_s23] sm:$0x7] %v887_v17 }
 0x795 PF: > { %s14_s15 = sadd.s32 1, %s1119_s15  }
 0x796   : > { %p11_p4 = scmp.ge.s32.totalorder %s14_s15, 4  }
 0x798   :  { %13 = sbr.rel (!%p11_p4) target bundleno = 1 (0x1), region = 69 }

// kernel: vit_for_age_forward.15
= control target key start
LH: loop header
LB: loop body
LE: loop exit
PB: predicated region body
PF: predicated region fallthrough
CT: control target
= control target key end

     0   :  { %vm41_vm0 = vcmask 261120   ;;  %vm45_vm1 = vcmask 254976   ;;  %v465_v17 = vmov 0.0   ;;  %vm466_vm2 = vmmov 0   ;;  %s603_s0 = inlined_call_operand.vmem [shape: bf16[10,32], index: 0, kind: input, shape index: {}]   ;;  %s604_s3 = inlined_call_operand.vmem [shape: bf16[32,128], index: 3, kind: input, shape index: {}]   ;;  %s605_s7 = inlined_call_operand.vmem [shape: bf16[32,1], index: 7, kind: input, shape index: {}]   ;;  %s606_s5 = inlined_call_operand.vmem [shape: bf16[128,1], index: 5, kind: input, shape index: {}]   ;;  %s607_s1 = inlined_call_operand.vmem [shape: f32[1,32], index: 1, kind: input, shape index: {}]   ;;  %s608_s2 = inlined_call_operand.vmem [shape: f32[1,32], index: 2, kind: input, shape index: {}]   ;;  %s609_s8 = inlined_call_operand.<no memory space> [shape: f32[1,1], index: 8, kind: input, shape index: {}]   ;;  %s610_s4 = inlined_call_operand.vmem [shape: f32[1,128], index: 4, kind: input, shape index: {}]   ;;  %s611_s6 = inlined_call_operand.<no memory space> [shape: f32[1,1], index: 6, kind: input, shape index: {}]   ;;  %s612_s9 = inlined_call_operand.vmem [shape: f32[10,2], index: 9, kind: output, shape index: {}]  }
   0x1   :  { %v37_v0 = vld [vmem:[%s603_s0] sm:$0xf]  ;;  %v38_v1 = vld [vmem:[%s603_s0 + $0x4] sm:$0x1]  ;;  %402 = vmatprep.subr.bf16.mxu0 %v465_v17  ;;  %410 = vmatprep.subr.bf16.mxu1 %v465_v17  ;;  %v442_v18 = vld [vmem:[%s604_s3 + $0x8] sm:$0xff]   ;;  %v16_v45 = vstv %s609_s8  ;;  %s467_s8 = smov 1  }
   0x2   :  { %v39_v2 = vunpack.c.l.bf16 %v37_v0  ;;  %v40_v3 = vunpack.c.l.bf16 %v38_v1  ;;  %v441_v16 = vld [vmem:[%s604_s3] sm:$0xff]   ;;  %406 = vmatprep.mubr.msk.bf16.mxu0 %vm466_vm2, %v465_v17  ;;  %426 = vmatprep.mubr.msk.bf16.mxu1 %vm466_vm2, %v465_v17  ;;  %v446_v20 = vld [vmem:[%s606_s5 + $0x8] sm:$0xff]   ;;  %v447_v21 = vld [vmem:[%s606_s5 + $0x10] sm:$0xff]   ;;  %17 = vst [vmem:[#allocation3] sm:$0x1] %v16_v45  ;;  %vm355_vm3 = vcmask 7168  }
   0x3   :  { %403 = vmatpush3.bf16.msra.mxu0 %v441_v16  ;;  %v445_v19 = vld [vmem:[%s606_s5] sm:$0xff]   ;;  %v448_v22 = vld [vmem:[%s606_s5 + $0x18] sm:$0xff]   ;;  %v450_v24 = vld [vmem:[%s606_s5 + $0x28] sm:$0xff]   ;;  %vm358_vm4 = vcmask 15360   ;;  %vm360_vm5 = vcmask 9216  }
   0x4   :  { %v42_v4 = vsel %vm41_vm0, %v39_v2, 0.0  ;;  %v46_v5 = vsel %vm45_vm1, %v40_v3, 0.0  ;;  %404 = vmatprep.subr.bf16.mxu0 %v465_v17  ;;  %411 = vmatpush3.bf16.msra.mxu1 %v445_v19  ;;  %v449_v23 = vld [vmem:[%s606_s5 + $0x20] sm:$0xff]   ;;  %v444_v43 = vld [vmem:[%s605_s7 + $0x8] sm:$0xff]   ;;  %v451_v44 = vld [vmem:[%s606_s5 + $0x30] sm:$0xff]  }
   0x5   :  { %43 = vadd.xlane.f32.xlu0 %v42_v4  ;;  %412 = vmatprep.subr.bf16.mxu1 %v465_v17  ;;  %v366_v33 = vld [vmem:[%s607_s1] ss:$0 sm:$0xff]  ;;  %v452_v46 = vld [vmem:[%s606_s5 + $0x38] sm:$0xff]  }
   0x6   :  { %v367_v37 = vld [vmem:[%s608_s2] ss:$0 sm:$0xff] }
   0x7   :  { %405 = vmatpush3.bf16.msra.mxu0 %v442_v18  ;;  %v443_v41 = vld [vmem:[%s605_s7] sm:$0xff]  }
   0x8   :  { %430 = vmatprep.subr.bf16.mxu0 %v465_v17  ;;  %413 = vmatpush3.bf16.msra.mxu1 %v446_v20  ;;  %v368_v47 = vld [vmem:[%s610_s4] ss:$0 sm:$0xff] }
   0x9   :  { %47 = vadd.xlane.f32.xlu0 %v46_v5  ;;  %414 = vmatprep.subr.bf16.mxu1 %v465_v17  ;;  %v381_v56 = vld [vmem:[#allocation3] ss:$0 sm:$0xff] }
   0xc   :  { %415 = vmatpush3.bf16.msra.mxu1 %v447_v21 }
   0xd   :  { %416 = vmatprep.subr.bf16.mxu1 %v465_v17 }
  0x10   :  { %417 = vmatpush3.bf16.msra.mxu1 %v448_v22 }
  0x11   :  { %418 = vmatprep.subr.bf16.mxu1 %v465_v17 }
  0x14   :  { %419 = vmatpush3.bf16.msra.mxu1 %v449_v23 }
  0x15   :  { %420 = vmatprep.subr.bf16.mxu1 %v465_v17 }
  0x18   :  { %421 = vmatpush3.bf16.msra.mxu1 %v450_v24 }
  0x19   :  { %422 = vmatprep.subr.bf16.mxu1 %v465_v17 }
  0x1c   :  { %423 = vmatpush3.bf16.msra.mxu1 %v451_v44 }
  0x1d   :  { %424 = vmatprep.subr.bf16.mxu1 %v465_v17 }
  0x20   :  { %425 = vmatpush3.bf16.msra.mxu1 %v452_v46 }
  0x92   :  { %v44_v6 = vpop.xlane.xlu0 %43 }
  0x93   :  { %v50_v7 = vmul.f32 0.03125, %v44_v6  ;;  %v14_v6 = vstv %s611_s6 }
  0x94   :  { %15 = vst [vmem:[#allocation2] sm:$0x1] %v14_v6 }
  0x95   :  { %v52_v8 = vsub.f32 %v39_v2, %v50_v7 }
  0x96   :  { %v48_v9 = vpop.xlane.xlu0 %47 }
  0x97   :  { %v51_v10 = vmul.f32 0.03125, %v48_v9  ;;  %v54_v11 = vmul.f32 %v52_v8, %v52_v8 }
  0x99   :  { %v53_v12 = vsub.f32 %v40_v3, %v51_v10  ;;  %v56_v13 = vsel %vm41_vm0, %v54_v11, 0.0 }
  0x9a   :  { %57 = vadd.xlane.f32.xlu1 %v56_v13 }
  0x9b   :  { %v55_v14 = vmul.f32 %v53_v12, %v53_v12  ;;  %v372_v9 = vld [vmem:[#allocation2] ss:$0 sm:$0xff] }
  0x9d   :  { %v59_v15 = vsel %vm45_vm1, %v55_v14, 0.0 }
  0x9e   :  { %60 = vadd.xlane.f32.xlu1 %v59_v15 }
 0x127   :  { %v58_v25 = vpop.xlane.xlu1 %57 }
 0x128   :  { %v62_v26 = vmul.f32 0.03125, %v58_v25 }
 0x12a   :  { %v64_v27 = vadd.f32 1e-06, %v62_v26 }
 0x12b   :  { %v61_v28 = vpop.xlane.xlu1 %60 }
 0x12c   :  { %453 = vrsqrt.f32 %v64_v27  ;;  %v63_v29 = vmul.f32 0.03125, %v61_v28 }
 0x12e   :  { %v65_v30 = vadd.f32 1e-06, %v63_v29 }
 0x130   :  { %455 = vrsqrt.f32 %v65_v30 }
 0x136   :  { %v454_v31 = vpop.eup %453 }
 0x137   :  { %v68_v32 = vmul.f32 %v454_v31, %v52_v8 }
 0x139   :  { %v77_v36 = vmul.f32 %v366_v33, %v68_v32 }
 0x13a   :  { %v456_v34 = vpop.eup %455 }
 0x13b   :  { %v69_v35 = vmul.f32 %v456_v34, %v53_v12  ;;  %v86_v39 = vadd.f32 %v367_v37, %v77_v36 }
 0x13d   :  { %v78_v38 = vmul.f32 %v366_v33, %v69_v35 }
 0x13f   :  { %v87_v40 = vadd.f32 %v367_v37, %v78_v38 }
 0x141   :  { %v88_v42 = vpack.c.bf16 %v87_v40, %v86_v39 }
 0x143   :  { %407 = vmatmul.mubr.msk.bf16.vlgmr.msra.gmra.mrb[0].mxu0 %vm41_vm0, %v88_v42 }
 0x144   :  { %431 = vmatpush3.bf16.msra.mxu0 %v443_v41  ;;  %434 = vmatprep.mubr.msk.bf16.mxu0 %vm466_vm2, %v465_v17 }
 0x145   :  { %432 = vmatprep.subr.bf16.mxu0 %v465_v17 }
 0x148   :  { %433 = vmatpush3.bf16.msra.mxu0 %v444_v43 }
 0x14b   :  { %435 = vmatmul.mubr.msk.bf16.vlgmr.msra.gmra.mrb[4].mxu0 %vm41_vm0, %v88_v42 }
 0x216   :  { %v149_v48 = vpop.f32.mrb[0].mxu0 }
 0x217   :  { %v150_v49 = vadd.f32 %v368_v47, %v149_v48  ;;  %v408_v50 = vpop.f32.mrb[1].mxu0 }
 0x218   :  { %v152_v51 = vpop.f32.mrb[2].mxu0 }
 0x219   :  { %v153_v52 = vadd.f32 %v368_v47, %v152_v51  ;;  %v409_v53 = vpop.f32.mrb[3].mxu0  ;;  %v156_v54 = vmax.f32 %v150_v49, 0.0 }
 0x21b   :  { %v157_v55 = vmax.f32 %v153_v52, 0.0 }
 0x21d   :  { %v158_v57 = vpack.c.bf16 %v157_v55, %v156_v54 }
 0x21e   :  { %v328_v58 = vpop.f32.mrb[4].mxu0 }
 0x21f   :  { %v329_v59 = vadd.f32 %v381_v56, %v328_v58  ;;  %427 = vmatmul.mubr.bf16.vlgmr.msra.gmra.mrb[0].mxu1 %v158_v57  ;;  %v436_v60 = vpop.f32.mrb[5].mxu0 }
 0x220   :  { %v331_v61 = vpop.f32.mrb[6].mxu0 }
 0x221   :  { %v385_v62 = vmul.f32 -1.442695, %v329_v59  ;;  %v332_v63 = vadd.f32 %v381_v56, %v331_v61  ;;  %v437_v0 = vpop.f32.mrb[7].mxu0 }
 0x223   :  { %457 = vpow2.f32 %v385_v62  ;;  %v386_v1 = vmul.f32 -1.442695, %v332_v63 }
 0x225   :  { %459 = vpow2.f32 %v386_v1 }
 0x22d   :  { %v458_v2 = vpop.eup %457 }
 0x22e   :  { %v341_v3 = vadd.f32 1.0, %v458_v2 }
 0x22f   :  { %v460_v4 = vpop.eup %459 }
 0x230   :  { %461 = vrcp.f32 %v341_v3  ;;  %v342_v5 = vadd.f32 1.0, %v460_v4 }
 0x232   :  { %463 = vrcp.f32 %v342_v5 }
 0x23a   :  { %v462_v7 = vpop.eup %461 }
 0x23b   :  { %349 = vrot.lane.b32.xlu0 %v462_v7, %s467_s8 }
 0x23c   :  { %v464_v8 = vpop.eup %463 }
 0x23d   :  { %351 = vrot.lane.b32.xlu1 %v464_v8, %s467_s8 }
 0x2ad   :  { %v350_v13 = vpop.permute.xlu0 %349 }
 0x2af   :  { %v352_v18 = vpop.permute.xlu1 %351 }
 0x2f2   :  { %v264_v10 = vpop.f32.mrb[0].mxu1 }
 0x2f3   :  { %v265_v11 = vadd.f32 %v372_v9, %v264_v10  ;;  %v428_v12 = vpop.f32.mrb[1].mxu1 }
 0x2f4   :  { %v267_v14 = vpop.f32.mrb[2].mxu1 }
 0x2f5   :  { %v356_v15 = vsel %vm355_vm3, %v265_v11, %v350_v13  ;;  %v268_v16 = vadd.f32 %v372_v9, %v267_v14  ;;  %v429_v17 = vpop.f32.mrb[3].mxu1 }
 0x2f6   :  { %359 = vst.msk [vmem:[%s612_s9] sm:$0xff] %vm358_vm4, %v356_v15 }
 0x2f7   :  { %v357_v19 = vsel %vm355_vm3, %v268_v16, %v352_v18 }
 0x2f8   :  { %361 = vst.msk [vmem:[%s612_s9 + $0x8] sm:$0x3] %vm360_vm5, %v357_v19 }

</bundles_post_ra>
